<compile_context>
chip_gen: v7x
topology: tpu7x:2x2x1
jax: 0.10.0
libtpu: 0.0.40
codegen_flags: <defaults>
</compile_context>

<pallas_src>
import jax
import jax.numpy as jnp
from jax.experimental import pallas as pl
from jax.experimental.pallas import tpu as pltpu


def _lstm_kernel(xg_ref, h0_ref, c0_ref,
                 w_hh0_ref, w_ih1_ref, w_hh1_ref, b1_ref,
                 h1_ref, hn_ref, cn_ref,
                 h_scr, c_scr):
    """One grid step == one block of T_blk timesteps (fully unrolled inside)."""
    blk = pl.program_id(0)
    nblk = pl.num_programs(0)

    # Load the initial hidden state into the resident scratch on the first block.
    @pl.when(blk == 0)
    def _():
        h_scr[...] = h0_ref[...]
        c_scr[...] = c0_ref[...]

    H = h_scr.shape[-1]
    T = xg_ref.shape[0]          # static block size -> loop fully unrolls

    # Hoist weight loads out of the time loop (resident for the whole block).
    w_hh0 = w_hh0_ref[...]
    w_ih1 = w_ih1_ref[...]
    w_hh1 = w_hh1_ref[...]
    b1 = b1_ref[...]

    def gates_to_state(g, c_prev):
        # PyTorch gate order: i, f, g, o.
        # NOTE: at H=32 these are sub-128-lane slices; for real sizes pick H a
        # multiple of 128 so each gate is a lane-aligned (free) view.
        i = jax.nn.sigmoid(g[:, 0 * H:1 * H])
        f = jax.nn.sigmoid(g[:, 1 * H:2 * H])
        gg = jnp.tanh(g[:, 2 * H:3 * H])
        o = jax.nn.sigmoid(g[:, 3 * H:4 * H])
        c_new = f * c_prev + i * gg
        h_new = o * jnp.tanh(c_new)
        return h_new, c_new

    h0p = h_scr[0]
    c0p = c_scr[0]
    h1p = h_scr[1]
    c1p = c_scr[1]

    # Fully unrolled time loop (T is a static Python int): one basic block lets
    # the scheduler interleave layer-1(t) with layer-0(t+1).
    for t in range(T):
        # Layer 0: the input pre-activation was hoisted out of the kernel; only
        # the recurrent matmul remains on the serial path.
        g0 = xg_ref[t] + jnp.dot(h0p, w_hh0, preferred_element_type=jnp.float32)
        h0p, c0p = gates_to_state(g0, c0p)

        # Layer 1: input = layer-0 output of the same timestep.  The two dots
        # are independent and pipeline on the MXU.
        g1 = (jnp.dot(h0p, w_ih1, preferred_element_type=jnp.float32)
              + jnp.dot(h1p, w_hh1, preferred_element_type=jnp.float32)
              + b1)
        h1p, c1p = gates_to_state(g1, c1p)

        # Top-layer hidden state per timestep (fc is applied outside the kernel).
        h1_ref[t] = h1p

    # Persist the recurrent state for the next block.
    h_scr[0] = h0p
    c_scr[0] = c0p
    h_scr[1] = h1p
    c_scr[1] = c1p

    # Final hidden-state outputs: write once, on the last block only.
    @pl.when(blk == nblk - 1)
    def _():
        hn_ref[...] = h_scr[...]
        cn_ref[...] = c_scr[...]


def char_lstm_forward(x, hidden, params, *, t_blk=None):
    """x: (batch, seq, input_size); hidden: (h0, c0) each (num_layers, batch, hidden).

    Returns (out, (hn, cn)) matching the PyTorch module:
      out: (batch, seq, input_size), hn/cn: (num_layers, batch, hidden).
    """
    h0, c0 = hidden
    B, S, I = x.shape
    L, _, H = h0.shape
    assert L == 2, "kernel is specialized for num_layers=2"
    O = params["fc_w"].shape[1]

    if t_blk is None:
        t_blk = S                      # toy S=8 -> one grid step
    assert S % t_blk == 0
    n_blk = S // t_blk

    x_t = jnp.transpose(x, (1, 0, 2))  # (S, B, I)

    # (1) Hoisted layer-0 input projection: one large lane-dense matmul.
    xg = (jnp.dot(x_t.reshape(S * B, I), params["w_ih0"],
                  preferred_element_type=jnp.float32)
          + params["b0"]).reshape(S, B, 4 * H)

    full = lambda arr: pl.BlockSpec(arr.shape, lambda b: (0,) * arr.ndim)

    out_shapes = (
        jax.ShapeDtypeStruct((S, B, H), jnp.float32),   # top-layer h per timestep
        jax.ShapeDtypeStruct((L, B, H), jnp.float32),   # h_n
        jax.ShapeDtypeStruct((L, B, H), jnp.float32),   # c_n
    )

    grid_spec = pltpu.PrefetchScalarGridSpec(
        num_scalar_prefetch=0,
        grid=(n_blk,),
        in_specs=[
            pl.BlockSpec((t_blk, B, 4 * H), lambda b: (b, 0, 0)),  # pre-activations
            full(h0), full(c0),
            full(params["w_hh0"]),
            full(params["w_ih1"]), full(params["w_hh1"]), full(params["b1"]),
        ],
        out_specs=[
            pl.BlockSpec((t_blk, B, H), lambda b: (b, 0, 0)),
            pl.BlockSpec((L, B, H), lambda b: (0, 0, 0)),
            pl.BlockSpec((L, B, H), lambda b: (0, 0, 0)),
        ],
        scratch_shapes=[
            pltpu.VMEM((L, B, H), jnp.float32),  # h state carry across blocks
            pltpu.VMEM((L, B, H), jnp.float32),  # c state carry across blocks
        ],
    )

    h1_seq, hn, cn = pl.pallas_call(
        _lstm_kernel,
        out_shape=out_shapes,
        grid_spec=grid_spec,
        compiler_params=pltpu.CompilerParams(
            dimension_semantics=("arbitrary",)),   # time recurrence is sequential
    )(xg, h0, c0,
      params["w_hh0"], params["w_ih1"], params["w_hh1"], params["b1"])

    # (2) Hoisted fc: one lane-dense (B*S, H) @ (H, O) matmul outside the loop.
    h_top = jnp.transpose(h1_seq, (1, 0, 2)).reshape(B * S, H)
    out = (jnp.dot(h_top, params["fc_w"], preferred_element_type=jnp.float32)
           + params["fc_b"]).reshape(B, S, O)
    return out, (hn, cn)


def init_params(key, input_size, hidden_size):
    """Parameter init mirroring nn.LSTM(2 layers) + nn.Linear shapes.

    LSTM per-layer biases (b_ih + b_hh) are pre-summed.  Weights are stored
    transposed: (in_features, 4*hidden) / (hidden, out)."""
    H = hidden_size
    scale = 1.0 / jnp.sqrt(jnp.float32(H))
    ks = jax.random.split(key, 9)
    u = lambda k, shape: jax.random.uniform(k, shape, jnp.float32, -scale, scale)
    return {
        "w_ih0": u(ks[0], (input_size, 4 * H)),
        "w_hh0": u(ks[1], (H, 4 * H)),
        "b0":    u(ks[2], (1, 4 * H)) + u(ks[3], (1, 4 * H)),
        "w_ih1": u(ks[4], (H, 4 * H)),
        "w_hh1": u(ks[5], (H, 4 * H)),
        "b1":    u(ks[6], (1, 4 * H)) + u(ks[7], (1, 4 * H)),
        "fc_w":  u(ks[8], (H, input_size)),
        "fc_b":  jnp.zeros((1, input_size), jnp.float32),
    }


def reference_forward(x, hidden, params):
    """Pure-JAX reference for correctness checking."""
    h0, c0 = hidden
    H = h0.shape[-1]

    def cell(inp, h, c, w_ih, w_hh, b):
        g = inp @ w_ih + h @ w_hh + b
        i = jax.nn.sigmoid(g[:, :H])
        f = jax.nn.sigmoid(g[:, H:2 * H])
        gg = jnp.tanh(g[:, 2 * H:3 * H])
        o = jax.nn.sigmoid(g[:, 3 * H:])
        c_new = f * c + i * gg
        return o * jnp.tanh(c_new), c_new

    def step(carry, x_t):
        (h0_, c0_), (h1_, c1_) = carry
        h0n, c0n = cell(x_t, h0_, c0_, params["w_ih0"], params["w_hh0"], params["b0"])
        h1n, c1n = cell(h0n, h1_, c1_, params["w_ih1"], params["w_hh1"], params["b1"])
        y = h1n @ params["fc_w"] + params["fc_b"]
        return ((h0n, c0n), (h1n, c1n)), y

    x_t = jnp.transpose(x, (1, 0, 2))
    carry0 = ((h0[0], c0[0]), (h0[1], c0[1]))
    carry, ys = jax.lax.scan(step, carry0, x_t)
    (h0n, c0n), (h1n, c1n) = carry
    out = jnp.transpose(ys, (1, 0, 2))
    hn = jnp.stack([h0n, h1n])
    cn = jnp.stack([c0n, c1n])
    return out, (hn, cn)


if __name__ == "__main__":
    batch, seq, input_size, hidden_size, num_layers = 2, 8, 16, 32, 2

    key = jax.random.PRNGKey(0)
    k_x, k_p = jax.random.split(key)

    x = jax.random.normal(k_x, (batch, seq, input_size), jnp.float32)
    # init_hidden(batch_size): zeros of (num_layers, batch, hidden)
    h0 = jnp.zeros((num_layers, batch, hidden_size), jnp.float32)
    c0 = jnp.zeros((num_layers, batch, hidden_size), jnp.float32)
    params = init_params(k_p, input_size, hidden_size)

    out, (hn, cn) = char_lstm_forward(x, (h0, c0), params)
    jax.block_until_ready((out, hn, cn))

    out_ref, (hn_ref, cn_ref) = reference_forward(x, (h0, c0), params)
    assert jnp.allclose(out, out_ref, atol=1e-4), "output mismatch"
    assert jnp.allclose(hn, hn_ref, atol=1e-4), "h_n mismatch"
    assert jnp.allclose(cn, cn_ref, atol=1e-4), "c_n mismatch"

    print("KERNEL_OK")
</pallas_src>

<mosaic_0001>
module attributes {stable_mosaic.version = 11 : i64} {
  func.func @_lstm_kernel(%arg0: i32, %arg1: memref<8x2x128xf32, #tpu.memory_space<vmem>>, %arg2: memref<2x2x32xf32, #tpu.memory_space<vmem>>, %arg3: memref<2x2x32xf32, #tpu.memory_space<vmem>>, %arg4: memref<32x128xf32, #tpu.memory_space<vmem>>, %arg5: memref<32x128xf32, #tpu.memory_space<vmem>>, %arg6: memref<32x128xf32, #tpu.memory_space<vmem>>, %arg7: memref<1x128xf32, #tpu.memory_space<vmem>>, %arg8: memref<8x2x32xf32, #tpu.memory_space<vmem>>, %arg9: memref<2x2x32xf32, #tpu.memory_space<vmem>>, %arg10: memref<2x2x32xf32, #tpu.memory_space<vmem>>, %arg11: memref<2x2x32xf32, #tpu.memory_space<vmem>>, %arg12: memref<2x2x32xf32, #tpu.memory_space<vmem>>) attributes {dimension_semantics = [#tpu.dimension_semantics<arbitrary>], iteration_bounds = array<i64: 1>, scalar_prefetch = 0 : i64, scratch_operands = 2 : i64, tpu.core_type = #tpu.core_type<tc>, window_params = [{transform_indices = @transform_0, window_bounds = array<i64: 8, 2, 128>}, {pipeline_mode = #tpu.pipeline_mode<synchronous>, transform_indices = @transform_1, window_bounds = array<i64: 2, 2, 32>}, {pipeline_mode = #tpu.pipeline_mode<synchronous>, transform_indices = @transform_2, window_bounds = array<i64: 2, 2, 32>}, {pipeline_mode = #tpu.pipeline_mode<synchronous>, transform_indices = @transform_3, window_bounds = array<i64: 32, 128>}, {pipeline_mode = #tpu.pipeline_mode<synchronous>, transform_indices = @transform_4, window_bounds = array<i64: 32, 128>}, {pipeline_mode = #tpu.pipeline_mode<synchronous>, transform_indices = @transform_5, window_bounds = array<i64: 32, 128>}, {pipeline_mode = #tpu.pipeline_mode<synchronous>, transform_indices = @transform_6, window_bounds = array<i64: 1, 128>}, {transform_indices = @transform_7, window_bounds = array<i64: 8, 2, 32>}, {pipeline_mode = #tpu.pipeline_mode<synchronous>, transform_indices = @transform_8, window_bounds = array<i64: 2, 2, 32>}, {pipeline_mode = #tpu.pipeline_mode<synchronous>, transform_indices = @transform_9, window_bounds = array<i64: 2, 2, 32>}]} {
    %c0_i32 = arith.constant 0 : i32
    %0 = arith.cmpi eq, %arg0, %c0_i32 : i32
    %1 = arith.extui %0 : i1 to i32
    %c0_i32_0 = arith.constant 0 : i32
    %2 = arith.cmpi ne, %1, %c0_i32_0 : i32
    scf.if %2 {
      %c0_146 = arith.constant 0 : index
      %c0_147 = arith.constant 0 : index
      %c0_148 = arith.constant 0 : index
      %526 = vector.load %arg2[%c0_146, %c0_147, %c0_148] : memref<2x2x32xf32, #tpu.memory_space<vmem>>, vector<2x2x32xf32>
      %c0_149 = arith.constant 0 : index
      %c0_150 = arith.constant 0 : index
      %c0_151 = arith.constant 0 : index
      %527 = vector.load %arg11[%c0_149, %c0_150, %c0_151] : memref<2x2x32xf32, #tpu.memory_space<vmem>>, vector<2x2x32xf32>
      tpu.vector_store %arg11[%c0_149, %c0_150, %c0_151], %526 {strides = array<i32>} : memref<2x2x32xf32, #tpu.memory_space<vmem>>, vector<2x2x32xf32>,
      %c0_152 = arith.constant 0 : index
      %c0_153 = arith.constant 0 : index
      %c0_154 = arith.constant 0 : index
      %528 = vector.load %arg3[%c0_152, %c0_153, %c0_154] : memref<2x2x32xf32, #tpu.memory_space<vmem>>, vector<2x2x32xf32>
      %c0_155 = arith.constant 0 : index
      %c0_156 = arith.constant 0 : index
      %c0_157 = arith.constant 0 : index
      %529 = vector.load %arg12[%c0_155, %c0_156, %c0_157] : memref<2x2x32xf32, #tpu.memory_space<vmem>>, vector<2x2x32xf32>
      tpu.vector_store %arg12[%c0_155, %c0_156, %c0_157], %528 {strides = array<i32>} : memref<2x2x32xf32, #tpu.memory_space<vmem>>, vector<2x2x32xf32>,
    } else {
    }
    %c0 = arith.constant 0 : index
    %c0_1 = arith.constant 0 : index
    %3 = vector.load %arg4[%c0, %c0_1] : memref<32x128xf32, #tpu.memory_space<vmem>>, vector<32x128xf32>
    %c0_2 = arith.constant 0 : index
    %c0_3 = arith.constant 0 : index
    %4 = vector.load %arg5[%c0_2, %c0_3] : memref<32x128xf32, #tpu.memory_space<vmem>>, vector<32x128xf32>
    %c0_4 = arith.constant 0 : index
    %c0_5 = arith.constant 0 : index
    %5 = vector.load %arg6[%c0_4, %c0_5] : memref<32x128xf32, #tpu.memory_space<vmem>>, vector<32x128xf32>
    %c0_6 = arith.constant 0 : index
    %c0_7 = arith.constant 0 : index
    %6 = vector.load %arg7[%c0_6, %c0_7] : memref<1x128xf32, #tpu.memory_space<vmem>>, vector<1x128xf32>
    %c0_8 = arith.constant 0 : index
    %c0_9 = arith.constant 0 : index
    %c0_10 = arith.constant 0 : index
    %7 = vector.load %arg11[%c0_8, %c0_9, %c0_10] : memref<2x2x32xf32, #tpu.memory_space<vmem>>, vector<1x2x32xf32>
    %8 = vector.shape_cast %7 : vector<1x2x32xf32> to vector<2x32xf32>
    %c0_11 = arith.constant 0 : index
    %c0_12 = arith.constant 0 : index
    %c0_13 = arith.constant 0 : index
    %9 = vector.load %arg12[%c0_11, %c0_12, %c0_13] : memref<2x2x32xf32, #tpu.memory_space<vmem>>, vector<1x2x32xf32>
    %10 = vector.shape_cast %9 : vector<1x2x32xf32> to vector<2x32xf32>
    %c1 = arith.constant 1 : index
    %c0_14 = arith.constant 0 : index
    %c0_15 = arith.constant 0 : index
    %11 = vector.load %arg11[%c1, %c0_14, %c0_15] : memref<2x2x32xf32, #tpu.memory_space<vmem>>, vector<1x2x32xf32>
    %12 = vector.shape_cast %11 : vector<1x2x32xf32> to vector<2x32xf32>
    %c1_16 = arith.constant 1 : index
    %c0_17 = arith.constant 0 : index
    %c0_18 = arith.constant 0 : index
    %13 = vector.load %arg12[%c1_16, %c0_17, %c0_18] : memref<2x2x32xf32, #tpu.memory_space<vmem>>, vector<1x2x32xf32>
    %14 = vector.shape_cast %13 : vector<1x2x32xf32> to vector<2x32xf32>
    %c0_19 = arith.constant 0 : index
    %c0_20 = arith.constant 0 : index
    %c0_21 = arith.constant 0 : index
    %15 = vector.load %arg1[%c0_19, %c0_20, %c0_21] : memref<8x2x128xf32, #tpu.memory_space<vmem>>, vector<1x2x128xf32>
    %16 = vector.shape_cast %15 : vector<1x2x128xf32> to vector<2x128xf32>
    %cst = arith.constant dense<0.000000e+00> : vector<2x128xf32>
    %17 = tpu.matmul %8, %3, %cst {dimension_numbers = #tpu.dot_dimension_numbers<[1], [0], [0], [1], [0, 0, 1, 1], [], []>} : vector<2x32xf32>, vector<32x128xf32>, vector<2x128xf32> -> vector<2x128xf32>
    %18 = arith.addf %16, %17 : vector<2x128xf32>
    %19 = vector.extract_strided_slice %18 {offsets = [0, 0], sizes = [2, 32], strides = [1, 1]} : vector<2x128xf32> to vector<2x32xf32>
    %20 = arith.negf %19 : vector<2x32xf32>
    %21 = math.exp %20 : vector<2x32xf32>
    %cst_22 = arith.constant 1.000000e+00 : f32
    %22 = vector.broadcast %cst_22 : f32 to vector<2x32xf32>
    %23 = arith.addf %22, %21 : vector<2x32xf32>
    %24 = arith.divf %22, %23 : vector<2x32xf32>
    %25 = vector.extract_strided_slice %18 {offsets = [0, 32], sizes = [2, 32], strides = [1, 1]} : vector<2x128xf32> to vector<2x32xf32>
    %26 = arith.negf %25 : vector<2x32xf32>
    %27 = math.exp %26 : vector<2x32xf32>
    %cst_23 = arith.constant 1.000000e+00 : f32
    %28 = vector.broadcast %cst_23 : f32 to vector<2x32xf32>
    %29 = arith.addf %28, %27 : vector<2x32xf32>
    %30 = arith.divf %28, %29 : vector<2x32xf32>
    %31 = vector.extract_strided_slice %18 {offsets = [0, 64], sizes = [2, 32], strides = [1, 1]} : vector<2x128xf32> to vector<2x32xf32>
    %32 = math.tanh %31 : vector<2x32xf32>
    %33 = vector.extract_strided_slice %18 {offsets = [0, 96], sizes = [2, 32], strides = [1, 1]} : vector<2x128xf32> to vector<2x32xf32>
    %34 = arith.negf %33 : vector<2x32xf32>
    %35 = math.exp %34 : vector<2x32xf32>
    %cst_24 = arith.constant 1.000000e+00 : f32
    %36 = vector.broadcast %cst_24 : f32 to vector<2x32xf32>
    %37 = arith.addf %36, %35 : vector<2x32xf32>
    %38 = arith.divf %36, %37 : vector<2x32xf32>
    %39 = arith.mulf %30, %10 : vector<2x32xf32>
    %40 = arith.mulf %24, %32 : vector<2x32xf32>
    %41 = arith.addf %39, %40 : vector<2x32xf32>
    %42 = math.tanh %41 : vector<2x32xf32>
    %43 = arith.mulf %38, %42 : vector<2x32xf32>
    %cst_25 = arith.constant dense<0.000000e+00> : vector<2x128xf32>
    %44 = tpu.matmul %43, %4, %cst_25 {dimension_numbers = #tpu.dot_dimension_numbers<[1], [0], [0], [1], [0, 0, 1, 1], [], []>} : vector<2x32xf32>, vector<32x128xf32>, vector<2x128xf32> -> vector<2x128xf32>
    %cst_26 = arith.constant dense<0.000000e+00> : vector<2x128xf32>
    %45 = tpu.matmul %12, %5, %cst_26 {dimension_numbers = #tpu.dot_dimension_numbers<[1], [0], [0], [1], [0, 0, 1, 1], [], []>} : vector<2x32xf32>, vector<32x128xf32>, vector<2x128xf32> -> vector<2x128xf32>
    %46 = arith.addf %44, %45 : vector<2x128xf32>
    %47 = vector.broadcast %6 : vector<1x128xf32> to vector<2x128xf32>
    %48 = arith.addf %46, %47 : vector<2x128xf32>
    %49 = vector.extract_strided_slice %48 {offsets = [0, 0], sizes = [2, 32], strides = [1, 1]} : vector<2x128xf32> to vector<2x32xf32>
    %50 = arith.negf %49 : vector<2x32xf32>
    %51 = math.exp %50 : vector<2x32xf32>
    %cst_27 = arith.constant 1.000000e+00 : f32
    %52 = vector.broadcast %cst_27 : f32 to vector<2x32xf32>
    %53 = arith.addf %52, %51 : vector<2x32xf32>
    %54 = arith.divf %52, %53 : vector<2x32xf32>
    %55 = vector.extract_strided_slice %48 {offsets = [0, 32], sizes = [2, 32], strides = [1, 1]} : vector<2x128xf32> to vector<2x32xf32>
    %56 = arith.negf %55 : vector<2x32xf32>
    %57 = math.exp %56 : vector<2x32xf32>
    %cst_28 = arith.constant 1.000000e+00 : f32
    %58 = vector.broadcast %cst_28 : f32 to vector<2x32xf32>
    %59 = arith.addf %58, %57 : vector<2x32xf32>
    %60 = arith.divf %58, %59 : vector<2x32xf32>
    %61 = vector.extract_strided_slice %48 {offsets = [0, 64], sizes = [2, 32], strides = [1, 1]} : vector<2x128xf32> to vector<2x32xf32>
    %62 = math.tanh %61 : vector<2x32xf32>
    %63 = vector.extract_strided_slice %48 {offsets = [0, 96], sizes = [2, 32], strides = [1, 1]} : vector<2x128xf32> to vector<2x32xf32>
    %64 = arith.negf %63 : vector<2x32xf32>
    %65 = math.exp %64 : vector<2x32xf32>
    %cst_29 = arith.constant 1.000000e+00 : f32
    %66 = vector.broadcast %cst_29 : f32 to vector<2x32xf32>
    %67 = arith.addf %66, %65 : vector<2x32xf32>
    %68 = arith.divf %66, %67 : vector<2x32xf32>
    %69 = arith.mulf %60, %14 : vector<2x32xf32>
    %70 = arith.mulf %54, %62 : vector<2x32xf32>
    %71 = arith.addf %69, %70 : vector<2x32xf32>
    %72 = math.tanh %71 : vector<2x32xf32>
    %73 = arith.mulf %68, %72 : vector<2x32xf32>
    %c0_30 = arith.constant 0 : index
    %c0_31 = arith.constant 0 : index
    %c0_32 = arith.constant 0 : index
    %74 = vector.load %arg8[%c0_30, %c0_31, %c0_32] : memref<8x2x32xf32, #tpu.memory_space<vmem>>, vector<1x2x32xf32>
    %75 = vector.shape_cast %74 : vector<1x2x32xf32> to vector<2x32xf32>
    %76 = vector.shape_cast %73 : vector<2x32xf32> to vector<1x2x32xf32>
    tpu.vector_store %arg8[%c0_30, %c0_31, %c0_32], %76 {strides = array<i32>} : memref<8x2x32xf32, #tpu.memory_space<vmem>>, vector<1x2x32xf32>,
    %c1_33 = arith.constant 1 : index
    %c0_34 = arith.constant 0 : index
    %c0_35 = arith.constant 0 : index
    %77 = vector.load %arg1[%c1_33, %c0_34, %c0_35] : memref<8x2x128xf32, #tpu.memory_space<vmem>>, vector<1x2x128xf32>
    %78 = vector.shape_cast %77 : vector<1x2x128xf32> to vector<2x128xf32>
    %cst_36 = arith.constant dense<0.000000e+00> : vector<2x128xf32>
    %79 = tpu.matmul %43, %3, %cst_36 {dimension_numbers = #tpu.dot_dimension_numbers<[1], [0], [0], [1], [0, 0, 1, 1], [], []>} : vector<2x32xf32>, vector<32x128xf32>, vector<2x128xf32> -> vector<2x128xf32>
    %80 = arith.addf %78, %79 : vector<2x128xf32>
    %81 = vector.extract_strided_slice %80 {offsets = [0, 0], sizes = [2, 32], strides = [1, 1]} : vector<2x128xf32> to vector<2x32xf32>
    %82 = arith.negf %81 : vector<2x32xf32>
    %83 = math.exp %82 : vector<2x32xf32>
    %cst_37 = arith.constant 1.000000e+00 : f32
    %84 = vector.broadcast %cst_37 : f32 to vector<2x32xf32>
    %85 = arith.addf %84, %83 : vector<2x32xf32>
    %86 = arith.divf %84, %85 : vector<2x32xf32>
    %87 = vector.extract_strided_slice %80 {offsets = [0, 32], sizes = [2, 32], strides = [1, 1]} : vector<2x128xf32> to vector<2x32xf32>
    %88 = arith.negf %87 : vector<2x32xf32>
    %89 = math.exp %88 : vector<2x32xf32>
    %cst_38 = arith.constant 1.000000e+00 : f32
    %90 = vector.broadcast %cst_38 : f32 to vector<2x32xf32>
    %91 = arith.addf %90, %89 : vector<2x32xf32>
    %92 = arith.divf %90, %91 : vector<2x32xf32>
    %93 = vector.extract_strided_slice %80 {offsets = [0, 64], sizes = [2, 32], strides = [1, 1]} : vector<2x128xf32> to vector<2x32xf32>
    %94 = math.tanh %93 : vector<2x32xf32>
    %95 = vector.extract_strided_slice %80 {offsets = [0, 96], sizes = [2, 32], strides = [1, 1]} : vector<2x128xf32> to vector<2x32xf32>
    %96 = arith.negf %95 : vector<2x32xf32>
    %97 = math.exp %96 : vector<2x32xf32>
    %cst_39 = arith.constant 1.000000e+00 : f32
    %98 = vector.broadcast %cst_39 : f32 to vector<2x32xf32>
    %99 = arith.addf %98, %97 : vector<2x32xf32>
    %100 = arith.divf %98, %99 : vector<2x32xf32>
    %101 = arith.mulf %92, %41 : vector<2x32xf32>
    %102 = arith.mulf %86, %94 : vector<2x32xf32>
    %103 = arith.addf %101, %102 : vector<2x32xf32>
    %104 = math.tanh %103 : vector<2x32xf32>
    %105 = arith.mulf %100, %104 : vector<2x32xf32>
    %cst_40 = arith.constant dense<0.000000e+00> : vector<2x128xf32>
    %106 = tpu.matmul %105, %4, %cst_40 {dimension_numbers = #tpu.dot_dimension_numbers<[1], [0], [0], [1], [0, 0, 1, 1], [], []>} : vector<2x32xf32>, vector<32x128xf32>, vector<2x128xf32> -> vector<2x128xf32>
    %cst_41 = arith.constant dense<0.000000e+00> : vector<2x128xf32>
    %107 = tpu.matmul %73, %5, %cst_41 {dimension_numbers = #tpu.dot_dimension_numbers<[1], [0], [0], [1], [0, 0, 1, 1], [], []>} : vector<2x32xf32>, vector<32x128xf32>, vector<2x128xf32> -> vector<2x128xf32>
    %108 = arith.addf %106, %107 : vector<2x128xf32>
    %109 = vector.broadcast %6 : vector<1x128xf32> to vector<2x128xf32>
    %110 = arith.addf %108, %109 : vector<2x128xf32>
    %111 = vector.extract_strided_slice %110 {offsets = [0, 0], sizes = [2, 32], strides = [1, 1]} : vector<2x128xf32> to vector<2x32xf32>
    %112 = arith.negf %111 : vector<2x32xf32>
    %113 = math.exp %112 : vector<2x32xf32>
    %cst_42 = arith.constant 1.000000e+00 : f32
    %114 = vector.broadcast %cst_42 : f32 to vector<2x32xf32>
    %115 = arith.addf %114, %113 : vector<2x32xf32>
    %116 = arith.divf %114, %115 : vector<2x32xf32>
    %117 = vector.extract_strided_slice %110 {offsets = [0, 32], sizes = [2, 32], strides = [1, 1]} : vector<2x128xf32> to vector<2x32xf32>
    %118 = arith.negf %117 : vector<2x32xf32>
    %119 = math.exp %118 : vector<2x32xf32>
    %cst_43 = arith.constant 1.000000e+00 : f32
    %120 = vector.broadcast %cst_43 : f32 to vector<2x32xf32>
    %121 = arith.addf %120, %119 : vector<2x32xf32>
    %122 = arith.divf %120, %121 : vector<2x32xf32>
    %123 = vector.extract_strided_slice %110 {offsets = [0, 64], sizes = [2, 32], strides = [1, 1]} : vector<2x128xf32> to vector<2x32xf32>
    %124 = math.tanh %123 : vector<2x32xf32>
    %125 = vector.extract_strided_slice %110 {offsets = [0, 96], sizes = [2, 32], strides = [1, 1]} : vector<2x128xf32> to vector<2x32xf32>
    %126 = arith.negf %125 : vector<2x32xf32>
    %127 = math.exp %126 : vector<2x32xf32>
    %cst_44 = arith.constant 1.000000e+00 : f32
    %128 = vector.broadcast %cst_44 : f32 to vector<2x32xf32>
    %129 = arith.addf %128, %127 : vector<2x32xf32>
    %130 = arith.divf %128, %129 : vector<2x32xf32>
    %131 = arith.mulf %122, %71 : vector<2x32xf32>
    %132 = arith.mulf %116, %124 : vector<2x32xf32>
    %133 = arith.addf %131, %132 : vector<2x32xf32>
    %134 = math.tanh %133 : vector<2x32xf32>
    %135 = arith.mulf %130, %134 : vector<2x32xf32>
    %c1_45 = arith.constant 1 : index
    %c0_46 = arith.constant 0 : index
    %c0_47 = arith.constant 0 : index
    %136 = vector.load %arg8[%c1_45, %c0_46, %c0_47] : memref<8x2x32xf32, #tpu.memory_space<vmem>>, vector<1x2x32xf32>
    %137 = vector.shape_cast %136 : vector<1x2x32xf32> to vector<2x32xf32>
    %138 = vector.shape_cast %135 : vector<2x32xf32> to vector<1x2x32xf32>
    tpu.vector_store %arg8[%c1_45, %c0_46, %c0_47], %138 {strides = array<i32>} : memref<8x2x32xf32, #tpu.memory_space<vmem>>, vector<1x2x32xf32>,
    %c2 = arith.constant 2 : index
    %c0_48 = arith.constant 0 : index
    %c0_49 = arith.constant 0 : index
    %139 = vector.load %arg1[%c2, %c0_48, %c0_49] : memref<8x2x128xf32, #tpu.memory_space<vmem>>, vector<1x2x128xf32>
    %140 = vector.shape_cast %139 : vector<1x2x128xf32> to vector<2x128xf32>
    %cst_50 = arith.constant dense<0.000000e+00> : vector<2x128xf32>
    %141 = tpu.matmul %105, %3, %cst_50 {dimension_numbers = #tpu.dot_dimension_numbers<[1], [0], [0], [1], [0, 0, 1, 1], [], []>} : vector<2x32xf32>, vector<32x128xf32>, vector<2x128xf32> -> vector<2x128xf32>
    %142 = arith.addf %140, %141 : vector<2x128xf32>
    %143 = vector.extract_strided_slice %142 {offsets = [0, 0], sizes = [2, 32], strides = [1, 1]} : vector<2x128xf32> to vector<2x32xf32>
    %144 = arith.negf %143 : vector<2x32xf32>
    %145 = math.exp %144 : vector<2x32xf32>
    %cst_51 = arith.constant 1.000000e+00 : f32
    %146 = vector.broadcast %cst_51 : f32 to vector<2x32xf32>
    %147 = arith.addf %146, %145 : vector<2x32xf32>
    %148 = arith.divf %146, %147 : vector<2x32xf32>
    %149 = vector.extract_strided_slice %142 {offsets = [0, 32], sizes = [2, 32], strides = [1, 1]} : vector<2x128xf32> to vector<2x32xf32>
    %150 = arith.negf %149 : vector<2x32xf32>
    %151 = math.exp %150 : vector<2x32xf32>
    %cst_52 = arith.constant 1.000000e+00 : f32
    %152 = vector.broadcast %cst_52 : f32 to vector<2x32xf32>
    %153 = arith.addf %152, %151 : vector<2x32xf32>
    %154 = arith.divf %152, %153 : vector<2x32xf32>
    %155 = vector.extract_strided_slice %142 {offsets = [0, 64], sizes = [2, 32], strides = [1, 1]} : vector<2x128xf32> to vector<2x32xf32>
    %156 = math.tanh %155 : vector<2x32xf32>
    %157 = vector.extract_strided_slice %142 {offsets = [0, 96], sizes = [2, 32], strides = [1, 1]} : vector<2x128xf32> to vector<2x32xf32>
    %158 = arith.negf %157 : vector<2x32xf32>
    %159 = math.exp %158 : vector<2x32xf32>
    %cst_53 = arith.constant 1.000000e+00 : f32
    %160 = vector.broadcast %cst_53 : f32 to vector<2x32xf32>
    %161 = arith.addf %160, %159 : vector<2x32xf32>
    %162 = arith.divf %160, %161 : vector<2x32xf32>
    %163 = arith.mulf %154, %103 : vector<2x32xf32>
    %164 = arith.mulf %148, %156 : vector<2x32xf32>
    %165 = arith.addf %163, %164 : vector<2x32xf32>
    %166 = math.tanh %165 : vector<2x32xf32>
    %167 = arith.mulf %162, %166 : vector<2x32xf32>
    %cst_54 = arith.constant dense<0.000000e+00> : vector<2x128xf32>
    %168 = tpu.matmul %167, %4, %cst_54 {dimension_numbers = #tpu.dot_dimension_numbers<[1], [0], [0], [1], [0, 0, 1, 1], [], []>} : vector<2x32xf32>, vector<32x128xf32>, vector<2x128xf32> -> vector<2x128xf32>
    %cst_55 = arith.constant dense<0.000000e+00> : vector<2x128xf32>
    %169 = tpu.matmul %135, %5, %cst_55 {dimension_numbers = #tpu.dot_dimension_numbers<[1], [0], [0], [1], [0, 0, 1, 1], [], []>} : vector<2x32xf32>, vector<32x128xf32>, vector<2x128xf32> -> vector<2x128xf32>
    %170 = arith.addf %168, %169 : vector<2x128xf32>
    %171 = vector.broadcast %6 : vector<1x128xf32> to vector<2x128xf32>
    %172 = arith.addf %170, %171 : vector<2x128xf32>
    %173 = vector.extract_strided_slice %172 {offsets = [0, 0], sizes = [2, 32], strides = [1, 1]} : vector<2x128xf32> to vector<2x32xf32>
    %174 = arith.negf %173 : vector<2x32xf32>
    %175 = math.exp %174 : vector<2x32xf32>
    %cst_56 = arith.constant 1.000000e+00 : f32
    %176 = vector.broadcast %cst_56 : f32 to vector<2x32xf32>
    %177 = arith.addf %176, %175 : vector<2x32xf32>
    %178 = arith.divf %176, %177 : vector<2x32xf32>
    %179 = vector.extract_strided_slice %172 {offsets = [0, 32], sizes = [2, 32], strides = [1, 1]} : vector<2x128xf32> to vector<2x32xf32>
    %180 = arith.negf %179 : vector<2x32xf32>
    %181 = math.exp %180 : vector<2x32xf32>
    %cst_57 = arith.constant 1.000000e+00 : f32
    %182 = vector.broadcast %cst_57 : f32 to vector<2x32xf32>
    %183 = arith.addf %182, %181 : vector<2x32xf32>
    %184 = arith.divf %182, %183 : vector<2x32xf32>
    %185 = vector.extract_strided_slice %172 {offsets = [0, 64], sizes = [2, 32], strides = [1, 1]} : vector<2x128xf32> to vector<2x32xf32>
    %186 = math.tanh %185 : vector<2x32xf32>
    %187 = vector.extract_strided_slice %172 {offsets = [0, 96], sizes = [2, 32], strides = [1, 1]} : vector<2x128xf32> to vector<2x32xf32>
    %188 = arith.negf %187 : vector<2x32xf32>
    %189 = math.exp %188 : vector<2x32xf32>
    %cst_58 = arith.constant 1.000000e+00 : f32
    %190 = vector.broadcast %cst_58 : f32 to vector<2x32xf32>
    %191 = arith.addf %190, %189 : vector<2x32xf32>
    %192 = arith.divf %190, %191 : vector<2x32xf32>
    %193 = arith.mulf %184, %133 : vector<2x32xf32>
    %194 = arith.mulf %178, %186 : vector<2x32xf32>
    %195 = arith.addf %193, %194 : vector<2x32xf32>
    %196 = math.tanh %195 : vector<2x32xf32>
    %197 = arith.mulf %192, %196 : vector<2x32xf32>
    %c2_59 = arith.constant 2 : index
    %c0_60 = arith.constant 0 : index
    %c0_61 = arith.constant 0 : index
    %198 = vector.load %arg8[%c2_59, %c0_60, %c0_61] : memref<8x2x32xf32, #tpu.memory_space<vmem>>, vector<1x2x32xf32>
    %199 = vector.shape_cast %198 : vector<1x2x32xf32> to vector<2x32xf32>
    %200 = vector.shape_cast %197 : vector<2x32xf32> to vector<1x2x32xf32>
    tpu.vector_store %arg8[%c2_59, %c0_60, %c0_61], %200 {strides = array<i32>} : memref<8x2x32xf32, #tpu.memory_space<vmem>>, vector<1x2x32xf32>,
    %c3 = arith.constant 3 : index
    %c0_62 = arith.constant 0 : index
    %c0_63 = arith.constant 0 : index
    %201 = vector.load %arg1[%c3, %c0_62, %c0_63] : memref<8x2x128xf32, #tpu.memory_space<vmem>>, vector<1x2x128xf32>
    %202 = vector.shape_cast %201 : vector<1x2x128xf32> to vector<2x128xf32>
    %cst_64 = arith.constant dense<0.000000e+00> : vector<2x128xf32>
    %203 = tpu.matmul %167, %3, %cst_64 {dimension_numbers = #tpu.dot_dimension_numbers<[1], [0], [0], [1], [0, 0, 1, 1], [], []>} : vector<2x32xf32>, vector<32x128xf32>, vector<2x128xf32> -> vector<2x128xf32>
    %204 = arith.addf %202, %203 : vector<2x128xf32>
    %205 = vector.extract_strided_slice %204 {offsets = [0, 0], sizes = [2, 32], strides = [1, 1]} : vector<2x128xf32> to vector<2x32xf32>
    %206 = arith.negf %205 : vector<2x32xf32>
    %207 = math.exp %206 : vector<2x32xf32>
    %cst_65 = arith.constant 1.000000e+00 : f32
    %208 = vector.broadcast %cst_65 : f32 to vector<2x32xf32>
    %209 = arith.addf %208, %207 : vector<2x32xf32>
    %210 = arith.divf %208, %209 : vector<2x32xf32>
    %211 = vector.extract_strided_slice %204 {offsets = [0, 32], sizes = [2, 32], strides = [1, 1]} : vector<2x128xf32> to vector<2x32xf32>
    %212 = arith.negf %211 : vector<2x32xf32>
    %213 = math.exp %212 : vector<2x32xf32>
    %cst_66 = arith.constant 1.000000e+00 : f32
    %214 = vector.broadcast %cst_66 : f32 to vector<2x32xf32>
    %215 = arith.addf %214, %213 : vector<2x32xf32>
    %216 = arith.divf %214, %215 : vector<2x32xf32>
    %217 = vector.extract_strided_slice %204 {offsets = [0, 64], sizes = [2, 32], strides = [1, 1]} : vector<2x128xf32> to vector<2x32xf32>
    %218 = math.tanh %217 : vector<2x32xf32>
    %219 = vector.extract_strided_slice %204 {offsets = [0, 96], sizes = [2, 32], strides = [1, 1]} : vector<2x128xf32> to vector<2x32xf32>
    %220 = arith.negf %219 : vector<2x32xf32>
    %221 = math.exp %220 : vector<2x32xf32>
    %cst_67 = arith.constant 1.000000e+00 : f32
    %222 = vector.broadcast %cst_67 : f32 to vector<2x32xf32>
    %223 = arith.addf %222, %221 : vector<2x32xf32>
    %224 = arith.divf %222, %223 : vector<2x32xf32>
    %225 = arith.mulf %216, %165 : vector<2x32xf32>
    %226 = arith.mulf %210, %218 : vector<2x32xf32>
    %227 = arith.addf %225, %226 : vector<2x32xf32>
    %228 = math.tanh %227 : vector<2x32xf32>
    %229 = arith.mulf %224, %228 : vector<2x32xf32>
    %cst_68 = arith.constant dense<0.000000e+00> : vector<2x128xf32>
    %230 = tpu.matmul %229, %4, %cst_68 {dimension_numbers = #tpu.dot_dimension_numbers<[1], [0], [0], [1], [0, 0, 1, 1], [], []>} : vector<2x32xf32>, vector<32x128xf32>, vector<2x128xf32> -> vector<2x128xf32>
    %cst_69 = arith.constant dense<0.000000e+00> : vector<2x128xf32>
    %231 = tpu.matmul %197, %5, %cst_69 {dimension_numbers = #tpu.dot_dimension_numbers<[1], [0], [0], [1], [0, 0, 1, 1], [], []>} : vector<2x32xf32>, vector<32x128xf32>, vector<2x128xf32> -> vector<2x128xf32>
    %232 = arith.addf %230, %231 : vector<2x128xf32>
    %233 = vector.broadcast %6 : vector<1x128xf32> to vector<2x128xf32>
    %234 = arith.addf %232, %233 : vector<2x128xf32>
    %235 = vector.extract_strided_slice %234 {offsets = [0, 0], sizes = [2, 32], strides = [1, 1]} : vector<2x128xf32> to vector<2x32xf32>
    %236 = arith.negf %235 : vector<2x32xf32>
    %237 = math.exp %236 : vector<2x32xf32>
    %cst_70 = arith.constant 1.000000e+00 : f32
    %238 = vector.broadcast %cst_70 : f32 to vector<2x32xf32>
    %239 = arith.addf %238, %237 : vector<2x32xf32>
    %240 = arith.divf %238, %239 : vector<2x32xf32>
    %241 = vector.extract_strided_slice %234 {offsets = [0, 32], sizes = [2, 32], strides = [1, 1]} : vector<2x128xf32> to vector<2x32xf32>
    %242 = arith.negf %241 : vector<2x32xf32>
    %243 = math.exp %242 : vector<2x32xf32>
    %cst_71 = arith.constant 1.000000e+00 : f32
    %244 = vector.broadcast %cst_71 : f32 to vector<2x32xf32>
    %245 = arith.addf %244, %243 : vector<2x32xf32>
    %246 = arith.divf %244, %245 : vector<2x32xf32>
    %247 = vector.extract_strided_slice %234 {offsets = [0, 64], sizes = [2, 32], strides = [1, 1]} : vector<2x128xf32> to vector<2x32xf32>
    %248 = math.tanh %247 : vector<2x32xf32>
    %249 = vector.extract_strided_slice %234 {offsets = [0, 96], sizes = [2, 32], strides = [1, 1]} : vector<2x128xf32> to vector<2x32xf32>
    %250 = arith.negf %249 : vector<2x32xf32>
    %251 = math.exp %250 : vector<2x32xf32>
    %cst_72 = arith.constant 1.000000e+00 : f32
    %252 = vector.broadcast %cst_72 : f32 to vector<2x32xf32>
    %253 = arith.addf %252, %251 : vector<2x32xf32>
    %254 = arith.divf %252, %253 : vector<2x32xf32>
    %255 = arith.mulf %246, %195 : vector<2x32xf32>
    %256 = arith.mulf %240, %248 : vector<2x32xf32>
    %257 = arith.addf %255, %256 : vector<2x32xf32>
    %258 = math.tanh %257 : vector<2x32xf32>
    %259 = arith.mulf %254, %258 : vector<2x32xf32>
    %c3_73 = arith.constant 3 : index
    %c0_74 = arith.constant 0 : index
    %c0_75 = arith.constant 0 : index
    %260 = vector.load %arg8[%c3_73, %c0_74, %c0_75] : memref<8x2x32xf32, #tpu.memory_space<vmem>>, vector<1x2x32xf32>
    %261 = vector.shape_cast %260 : vector<1x2x32xf32> to vector<2x32xf32>
    %262 = vector.shape_cast %259 : vector<2x32xf32> to vector<1x2x32xf32>
    tpu.vector_store %arg8[%c3_73, %c0_74, %c0_75], %262 {strides = array<i32>} : memref<8x2x32xf32, #tpu.memory_space<vmem>>, vector<1x2x32xf32>,
    %c4 = arith.constant 4 : index
    %c0_76 = arith.constant 0 : index
    %c0_77 = arith.constant 0 : index
    %263 = vector.load %arg1[%c4, %c0_76, %c0_77] : memref<8x2x128xf32, #tpu.memory_space<vmem>>, vector<1x2x128xf32>
    %264 = vector.shape_cast %263 : vector<1x2x128xf32> to vector<2x128xf32>
    %cst_78 = arith.constant dense<0.000000e+00> : vector<2x128xf32>
    %265 = tpu.matmul %229, %3, %cst_78 {dimension_numbers = #tpu.dot_dimension_numbers<[1], [0], [0], [1], [0, 0, 1, 1], [], []>} : vector<2x32xf32>, vector<32x128xf32>, vector<2x128xf32> -> vector<2x128xf32>
    %266 = arith.addf %264, %265 : vector<2x128xf32>
    %267 = vector.extract_strided_slice %266 {offsets = [0, 0], sizes = [2, 32], strides = [1, 1]} : vector<2x128xf32> to vector<2x32xf32>
    %268 = arith.negf %267 : vector<2x32xf32>
    %269 = math.exp %268 : vector<2x32xf32>
    %cst_79 = arith.constant 1.000000e+00 : f32
    %270 = vector.broadcast %cst_79 : f32 to vector<2x32xf32>
    %271 = arith.addf %270, %269 : vector<2x32xf32>
    %272 = arith.divf %270, %271 : vector<2x32xf32>
    %273 = vector.extract_strided_slice %266 {offsets = [0, 32], sizes = [2, 32], strides = [1, 1]} : vector<2x128xf32> to vector<2x32xf32>
    %274 = arith.negf %273 : vector<2x32xf32>
    %275 = math.exp %274 : vector<2x32xf32>
    %cst_80 = arith.constant 1.000000e+00 : f32
    %276 = vector.broadcast %cst_80 : f32 to vector<2x32xf32>
    %277 = arith.addf %276, %275 : vector<2x32xf32>
    %278 = arith.divf %276, %277 : vector<2x32xf32>
    %279 = vector.extract_strided_slice %266 {offsets = [0, 64], sizes = [2, 32], strides = [1, 1]} : vector<2x128xf32> to vector<2x32xf32>
    %280 = math.tanh %279 : vector<2x32xf32>
    %281 = vector.extract_strided_slice %266 {offsets = [0, 96], sizes = [2, 32], strides = [1, 1]} : vector<2x128xf32> to vector<2x32xf32>
    %282 = arith.negf %281 : vector<2x32xf32>
    %283 = math.exp %282 : vector<2x32xf32>
    %cst_81 = arith.constant 1.000000e+00 : f32
    %284 = vector.broadcast %cst_81 : f32 to vector<2x32xf32>
    %285 = arith.addf %284, %283 : vector<2x32xf32>
    %286 = arith.divf %284, %285 : vector<2x32xf32>
    %287 = arith.mulf %278, %227 : vector<2x32xf32>
    %288 = arith.mulf %272, %280 : vector<2x32xf32>
    %289 = arith.addf %287, %288 : vector<2x32xf32>
    %290 = math.tanh %289 : vector<2x32xf32>
    %291 = arith.mulf %286, %290 : vector<2x32xf32>
    %cst_82 = arith.constant dense<0.000000e+00> : vector<2x128xf32>
    %292 = tpu.matmul %291, %4, %cst_82 {dimension_numbers = #tpu.dot_dimension_numbers<[1], [0], [0], [1], [0, 0, 1, 1], [], []>} : vector<2x32xf32>, vector<32x128xf32>, vector<2x128xf32> -> vector<2x128xf32>
    %cst_83 = arith.constant dense<0.000000e+00> : vector<2x128xf32>
    %293 = tpu.matmul %259, %5, %cst_83 {dimension_numbers = #tpu.dot_dimension_numbers<[1], [0], [0], [1], [0, 0, 1, 1], [], []>} : vector<2x32xf32>, vector<32x128xf32>, vector<2x128xf32> -> vector<2x128xf32>
    %294 = arith.addf %292, %293 : vector<2x128xf32>
    %295 = vector.broadcast %6 : vector<1x128xf32> to vector<2x128xf32>
    %296 = arith.addf %294, %295 : vector<2x128xf32>
    %297 = vector.extract_strided_slice %296 {offsets = [0, 0], sizes = [2, 32], strides = [1, 1]} : vector<2x128xf32> to vector<2x32xf32>
    %298 = arith.negf %297 : vector<2x32xf32>
    %299 = math.exp %298 : vector<2x32xf32>
    %cst_84 = arith.constant 1.000000e+00 : f32
    %300 = vector.broadcast %cst_84 : f32 to vector<2x32xf32>
    %301 = arith.addf %300, %299 : vector<2x32xf32>
    %302 = arith.divf %300, %301 : vector<2x32xf32>
    %303 = vector.extract_strided_slice %296 {offsets = [0, 32], sizes = [2, 32], strides = [1, 1]} : vector<2x128xf32> to vector<2x32xf32>
    %304 = arith.negf %303 : vector<2x32xf32>
    %305 = math.exp %304 : vector<2x32xf32>
    %cst_85 = arith.constant 1.000000e+00 : f32
    %306 = vector.broadcast %cst_85 : f32 to vector<2x32xf32>
    %307 = arith.addf %306, %305 : vector<2x32xf32>
    %308 = arith.divf %306, %307 : vector<2x32xf32>
    %309 = vector.extract_strided_slice %296 {offsets = [0, 64], sizes = [2, 32], strides = [1, 1]} : vector<2x128xf32> to vector<2x32xf32>
    %310 = math.tanh %309 : vector<2x32xf32>
    %311 = vector.extract_strided_slice %296 {offsets = [0, 96], sizes = [2, 32], strides = [1, 1]} : vector<2x128xf32> to vector<2x32xf32>
    %312 = arith.negf %311 : vector<2x32xf32>
    %313 = math.exp %312 : vector<2x32xf32>
    %cst_86 = arith.constant 1.000000e+00 : f32
    %314 = vector.broadcast %cst_86 : f32 to vector<2x32xf32>
    %315 = arith.addf %314, %313 : vector<2x32xf32>
    %316 = arith.divf %314, %315 : vector<2x32xf32>
    %317 = arith.mulf %308, %257 : vector<2x32xf32>
    %318 = arith.mulf %302, %310 : vector<2x32xf32>
    %319 = arith.addf %317, %318 : vector<2x32xf32>
    %320 = math.tanh %319 : vector<2x32xf32>
    %321 = arith.mulf %316, %320 : vector<2x32xf32>
    %c4_87 = arith.constant 4 : index
    %c0_88 = arith.constant 0 : index
    %c0_89 = arith.constant 0 : index
    %322 = vector.load %arg8[%c4_87, %c0_88, %c0_89] : memref<8x2x32xf32, #tpu.memory_space<vmem>>, vector<1x2x32xf32>
    %323 = vector.shape_cast %322 : vector<1x2x32xf32> to vector<2x32xf32>
    %324 = vector.shape_cast %321 : vector<2x32xf32> to vector<1x2x32xf32>
    tpu.vector_store %arg8[%c4_87, %c0_88, %c0_89], %324 {strides = array<i32>} : memref<8x2x32xf32, #tpu.memory_space<vmem>>, vector<1x2x32xf32>,
    %c5 = arith.constant 5 : index
    %c0_90 = arith.constant 0 : index
    %c0_91 = arith.constant 0 : index
    %325 = vector.load %arg1[%c5, %c0_90, %c0_91] : memref<8x2x128xf32, #tpu.memory_space<vmem>>, vector<1x2x128xf32>
    %326 = vector.shape_cast %325 : vector<1x2x128xf32> to vector<2x128xf32>
    %cst_92 = arith.constant dense<0.000000e+00> : vector<2x128xf32>
    %327 = tpu.matmul %291, %3, %cst_92 {dimension_numbers = #tpu.dot_dimension_numbers<[1], [0], [0], [1], [0, 0, 1, 1], [], []>} : vector<2x32xf32>, vector<32x128xf32>, vector<2x128xf32> -> vector<2x128xf32>
    %328 = arith.addf %326, %327 : vector<2x128xf32>
    %329 = vector.extract_strided_slice %328 {offsets = [0, 0], sizes = [2, 32], strides = [1, 1]} : vector<2x128xf32> to vector<2x32xf32>
    %330 = arith.negf %329 : vector<2x32xf32>
    %331 = math.exp %330 : vector<2x32xf32>
    %cst_93 = arith.constant 1.000000e+00 : f32
    %332 = vector.broadcast %cst_93 : f32 to vector<2x32xf32>
    %333 = arith.addf %332, %331 : vector<2x32xf32>
    %334 = arith.divf %332, %333 : vector<2x32xf32>
    %335 = vector.extract_strided_slice %328 {offsets = [0, 32], sizes = [2, 32], strides = [1, 1]} : vector<2x128xf32> to vector<2x32xf32>
    %336 = arith.negf %335 : vector<2x32xf32>
    %337 = math.exp %336 : vector<2x32xf32>
    %cst_94 = arith.constant 1.000000e+00 : f32
    %338 = vector.broadcast %cst_94 : f32 to vector<2x32xf32>
    %339 = arith.addf %338, %337 : vector<2x32xf32>
    %340 = arith.divf %338, %339 : vector<2x32xf32>
    %341 = vector.extract_strided_slice %328 {offsets = [0, 64], sizes = [2, 32], strides = [1, 1]} : vector<2x128xf32> to vector<2x32xf32>
    %342 = math.tanh %341 : vector<2x32xf32>
    %343 = vector.extract_strided_slice %328 {offsets = [0, 96], sizes = [2, 32], strides = [1, 1]} : vector<2x128xf32> to vector<2x32xf32>
    %344 = arith.negf %343 : vector<2x32xf32>
    %345 = math.exp %344 : vector<2x32xf32>
    %cst_95 = arith.constant 1.000000e+00 : f32
    %346 = vector.broadcast %cst_95 : f32 to vector<2x32xf32>
    %347 = arith.addf %346, %345 : vector<2x32xf32>
    %348 = arith.divf %346, %347 : vector<2x32xf32>
    %349 = arith.mulf %340, %289 : vector<2x32xf32>
    %350 = arith.mulf %334, %342 : vector<2x32xf32>
    %351 = arith.addf %349, %350 : vector<2x32xf32>
    %352 = math.tanh %351 : vector<2x32xf32>
    %353 = arith.mulf %348, %352 : vector<2x32xf32>
    %cst_96 = arith.constant dense<0.000000e+00> : vector<2x128xf32>
    %354 = tpu.matmul %353, %4, %cst_96 {dimension_numbers = #tpu.dot_dimension_numbers<[1], [0], [0], [1], [0, 0, 1, 1], [], []>} : vector<2x32xf32>, vector<32x128xf32>, vector<2x128xf32> -> vector<2x128xf32>
    %cst_97 = arith.constant dense<0.000000e+00> : vector<2x128xf32>
    %355 = tpu.matmul %321, %5, %cst_97 {dimension_numbers = #tpu.dot_dimension_numbers<[1], [0], [0], [1], [0, 0, 1, 1], [], []>} : vector<2x32xf32>, vector<32x128xf32>, vector<2x128xf32> -> vector<2x128xf32>
    %356 = arith.addf %354, %355 : vector<2x128xf32>
    %357 = vector.broadcast %6 : vector<1x128xf32> to vector<2x128xf32>
    %358 = arith.addf %356, %357 : vector<2x128xf32>
    %359 = vector.extract_strided_slice %358 {offsets = [0, 0], sizes = [2, 32], strides = [1, 1]} : vector<2x128xf32> to vector<2x32xf32>
    %360 = arith.negf %359 : vector<2x32xf32>
    %361 = math.exp %360 : vector<2x32xf32>
    %cst_98 = arith.constant 1.000000e+00 : f32
    %362 = vector.broadcast %cst_98 : f32 to vector<2x32xf32>
    %363 = arith.addf %362, %361 : vector<2x32xf32>
    %364 = arith.divf %362, %363 : vector<2x32xf32>
    %365 = vector.extract_strided_slice %358 {offsets = [0, 32], sizes = [2, 32], strides = [1, 1]} : vector<2x128xf32> to vector<2x32xf32>
    %366 = arith.negf %365 : vector<2x32xf32>
    %367 = math.exp %366 : vector<2x32xf32>
    %cst_99 = arith.constant 1.000000e+00 : f32
    %368 = vector.broadcast %cst_99 : f32 to vector<2x32xf32>
    %369 = arith.addf %368, %367 : vector<2x32xf32>
    %370 = arith.divf %368, %369 : vector<2x32xf32>
    %371 = vector.extract_strided_slice %358 {offsets = [0, 64], sizes = [2, 32], strides = [1, 1]} : vector<2x128xf32> to vector<2x32xf32>
    %372 = math.tanh %371 : vector<2x32xf32>
    %373 = vector.extract_strided_slice %358 {offsets = [0, 96], sizes = [2, 32], strides = [1, 1]} : vector<2x128xf32> to vector<2x32xf32>
    %374 = arith.negf %373 : vector<2x32xf32>
    %375 = math.exp %374 : vector<2x32xf32>
    %cst_100 = arith.constant 1.000000e+00 : f32
    %376 = vector.broadcast %cst_100 : f32 to vector<2x32xf32>
    %377 = arith.addf %376, %375 : vector<2x32xf32>
    %378 = arith.divf %376, %377 : vector<2x32xf32>
    %379 = arith.mulf %370, %319 : vector<2x32xf32>
    %380 = arith.mulf %364, %372 : vector<2x32xf32>
    %381 = arith.addf %379, %380 : vector<2x32xf32>
    %382 = math.tanh %381 : vector<2x32xf32>
    %383 = arith.mulf %378, %382 : vector<2x32xf32>
    %c5_101 = arith.constant 5 : index
    %c0_102 = arith.constant 0 : index
    %c0_103 = arith.constant 0 : index
    %384 = vector.load %arg8[%c5_101, %c0_102, %c0_103] : memref<8x2x32xf32, #tpu.memory_space<vmem>>, vector<1x2x32xf32>
    %385 = vector.shape_cast %384 : vector<1x2x32xf32> to vector<2x32xf32>
    %386 = vector.shape_cast %383 : vector<2x32xf32> to vector<1x2x32xf32>
    tpu.vector_store %arg8[%c5_101, %c0_102, %c0_103], %386 {strides = array<i32>} : memref<8x2x32xf32, #tpu.memory_space<vmem>>, vector<1x2x32xf32>,
    %c6 = arith.constant 6 : index
    %c0_104 = arith.constant 0 : index
    %c0_105 = arith.constant 0 : index
    %387 = vector.load %arg1[%c6, %c0_104, %c0_105] : memref<8x2x128xf32, #tpu.memory_space<vmem>>, vector<1x2x128xf32>
    %388 = vector.shape_cast %387 : vector<1x2x128xf32> to vector<2x128xf32>
    %cst_106 = arith.constant dense<0.000000e+00> : vector<2x128xf32>
    %389 = tpu.matmul %353, %3, %cst_106 {dimension_numbers = #tpu.dot_dimension_numbers<[1], [0], [0], [1], [0, 0, 1, 1], [], []>} : vector<2x32xf32>, vector<32x128xf32>, vector<2x128xf32> -> vector<2x128xf32>
    %390 = arith.addf %388, %389 : vector<2x128xf32>
    %391 = vector.extract_strided_slice %390 {offsets = [0, 0], sizes = [2, 32], strides = [1, 1]} : vector<2x128xf32> to vector<2x32xf32>
    %392 = arith.negf %391 : vector<2x32xf32>
    %393 = math.exp %392 : vector<2x32xf32>
    %cst_107 = arith.constant 1.000000e+00 : f32
    %394 = vector.broadcast %cst_107 : f32 to vector<2x32xf32>
    %395 = arith.addf %394, %393 : vector<2x32xf32>
    %396 = arith.divf %394, %395 : vector<2x32xf32>
    %397 = vector.extract_strided_slice %390 {offsets = [0, 32], sizes = [2, 32], strides = [1, 1]} : vector<2x128xf32> to vector<2x32xf32>
    %398 = arith.negf %397 : vector<2x32xf32>
    %399 = math.exp %398 : vector<2x32xf32>
    %cst_108 = arith.constant 1.000000e+00 : f32
    %400 = vector.broadcast %cst_108 : f32 to vector<2x32xf32>
    %401 = arith.addf %400, %399 : vector<2x32xf32>
    %402 = arith.divf %400, %401 : vector<2x32xf32>
    %403 = vector.extract_strided_slice %390 {offsets = [0, 64], sizes = [2, 32], strides = [1, 1]} : vector<2x128xf32> to vector<2x32xf32>
    %404 = math.tanh %403 : vector<2x32xf32>
    %405 = vector.extract_strided_slice %390 {offsets = [0, 96], sizes = [2, 32], strides = [1, 1]} : vector<2x128xf32> to vector<2x32xf32>
    %406 = arith.negf %405 : vector<2x32xf32>
    %407 = math.exp %406 : vector<2x32xf32>
    %cst_109 = arith.constant 1.000000e+00 : f32
    %408 = vector.broadcast %cst_109 : f32 to vector<2x32xf32>
    %409 = arith.addf %408, %407 : vector<2x32xf32>
    %410 = arith.divf %408, %409 : vector<2x32xf32>
    %411 = arith.mulf %402, %351 : vector<2x32xf32>
    %412 = arith.mulf %396, %404 : vector<2x32xf32>
    %413 = arith.addf %411, %412 : vector<2x32xf32>
    %414 = math.tanh %413 : vector<2x32xf32>
    %415 = arith.mulf %410, %414 : vector<2x32xf32>
    %cst_110 = arith.constant dense<0.000000e+00> : vector<2x128xf32>
    %416 = tpu.matmul %415, %4, %cst_110 {dimension_numbers = #tpu.dot_dimension_numbers<[1], [0], [0], [1], [0, 0, 1, 1], [], []>} : vector<2x32xf32>, vector<32x128xf32>, vector<2x128xf32> -> vector<2x128xf32>
    %cst_111 = arith.constant dense<0.000000e+00> : vector<2x128xf32>
    %417 = tpu.matmul %383, %5, %cst_111 {dimension_numbers = #tpu.dot_dimension_numbers<[1], [0], [0], [1], [0, 0, 1, 1], [], []>} : vector<2x32xf32>, vector<32x128xf32>, vector<2x128xf32> -> vector<2x128xf32>
    %418 = arith.addf %416, %417 : vector<2x128xf32>
    %419 = vector.broadcast %6 : vector<1x128xf32> to vector<2x128xf32>
    %420 = arith.addf %418, %419 : vector<2x128xf32>
    %421 = vector.extract_strided_slice %420 {offsets = [0, 0], sizes = [2, 32], strides = [1, 1]} : vector<2x128xf32> to vector<2x32xf32>
    %422 = arith.negf %421 : vector<2x32xf32>
    %423 = math.exp %422 : vector<2x32xf32>
    %cst_112 = arith.constant 1.000000e+00 : f32
    %424 = vector.broadcast %cst_112 : f32 to vector<2x32xf32>
    %425 = arith.addf %424, %423 : vector<2x32xf32>
    %426 = arith.divf %424, %425 : vector<2x32xf32>
    %427 = vector.extract_strided_slice %420 {offsets = [0, 32], sizes = [2, 32], strides = [1, 1]} : vector<2x128xf32> to vector<2x32xf32>
    %428 = arith.negf %427 : vector<2x32xf32>
    %429 = math.exp %428 : vector<2x32xf32>
    %cst_113 = arith.constant 1.000000e+00 : f32
    %430 = vector.broadcast %cst_113 : f32 to vector<2x32xf32>
    %431 = arith.addf %430, %429 : vector<2x32xf32>
    %432 = arith.divf %430, %431 : vector<2x32xf32>
    %433 = vector.extract_strided_slice %420 {offsets = [0, 64], sizes = [2, 32], strides = [1, 1]} : vector<2x128xf32> to vector<2x32xf32>
    %434 = math.tanh %433 : vector<2x32xf32>
    %435 = vector.extract_strided_slice %420 {offsets = [0, 96], sizes = [2, 32], strides = [1, 1]} : vector<2x128xf32> to vector<2x32xf32>
    %436 = arith.negf %435 : vector<2x32xf32>
    %437 = math.exp %436 : vector<2x32xf32>
    %cst_114 = arith.constant 1.000000e+00 : f32
    %438 = vector.broadcast %cst_114 : f32 to vector<2x32xf32>
    %439 = arith.addf %438, %437 : vector<2x32xf32>
    %440 = arith.divf %438, %439 : vector<2x32xf32>
    %441 = arith.mulf %432, %381 : vector<2x32xf32>
    %442 = arith.mulf %426, %434 : vector<2x32xf32>
    %443 = arith.addf %441, %442 : vector<2x32xf32>
    %444 = math.tanh %443 : vector<2x32xf32>
    %445 = arith.mulf %440, %444 : vector<2x32xf32>
    %c6_115 = arith.constant 6 : index
    %c0_116 = arith.constant 0 : index
    %c0_117 = arith.constant 0 : index
    %446 = vector.load %arg8[%c6_115, %c0_116, %c0_117] : memref<8x2x32xf32, #tpu.memory_space<vmem>>, vector<1x2x32xf32>
    %447 = vector.shape_cast %446 : vector<1x2x32xf32> to vector<2x32xf32>
    %448 = vector.shape_cast %445 : vector<2x32xf32> to vector<1x2x32xf32>
    tpu.vector_store %arg8[%c6_115, %c0_116, %c0_117], %448 {strides = array<i32>} : memref<8x2x32xf32, #tpu.memory_space<vmem>>, vector<1x2x32xf32>,
    %c7 = arith.constant 7 : index
    %c0_118 = arith.constant 0 : index
    %c0_119 = arith.constant 0 : index
    %449 = vector.load %arg1[%c7, %c0_118, %c0_119] : memref<8x2x128xf32, #tpu.memory_space<vmem>>, vector<1x2x128xf32>
    %450 = vector.shape_cast %449 : vector<1x2x128xf32> to vector<2x128xf32>
    %cst_120 = arith.constant dense<0.000000e+00> : vector<2x128xf32>
    %451 = tpu.matmul %415, %3, %cst_120 {dimension_numbers = #tpu.dot_dimension_numbers<[1], [0], [0], [1], [0, 0, 1, 1], [], []>} : vector<2x32xf32>, vector<32x128xf32>, vector<2x128xf32> -> vector<2x128xf32>
    %452 = arith.addf %450, %451 : vector<2x128xf32>
    %453 = vector.extract_strided_slice %452 {offsets = [0, 0], sizes = [2, 32], strides = [1, 1]} : vector<2x128xf32> to vector<2x32xf32>
    %454 = arith.negf %453 : vector<2x32xf32>
    %455 = math.exp %454 : vector<2x32xf32>
    %cst_121 = arith.constant 1.000000e+00 : f32
    %456 = vector.broadcast %cst_121 : f32 to vector<2x32xf32>
    %457 = arith.addf %456, %455 : vector<2x32xf32>
    %458 = arith.divf %456, %457 : vector<2x32xf32>
    %459 = vector.extract_strided_slice %452 {offsets = [0, 32], sizes = [2, 32], strides = [1, 1]} : vector<2x128xf32> to vector<2x32xf32>
    %460 = arith.negf %459 : vector<2x32xf32>
    %461 = math.exp %460 : vector<2x32xf32>
    %cst_122 = arith.constant 1.000000e+00 : f32
    %462 = vector.broadcast %cst_122 : f32 to vector<2x32xf32>
    %463 = arith.addf %462, %461 : vector<2x32xf32>
    %464 = arith.divf %462, %463 : vector<2x32xf32>
    %465 = vector.extract_strided_slice %452 {offsets = [0, 64], sizes = [2, 32], strides = [1, 1]} : vector<2x128xf32> to vector<2x32xf32>
    %466 = math.tanh %465 : vector<2x32xf32>
    %467 = vector.extract_strided_slice %452 {offsets = [0, 96], sizes = [2, 32], strides = [1, 1]} : vector<2x128xf32> to vector<2x32xf32>
    %468 = arith.negf %467 : vector<2x32xf32>
    %469 = math.exp %468 : vector<2x32xf32>
    %cst_123 = arith.constant 1.000000e+00 : f32
    %470 = vector.broadcast %cst_123 : f32 to vector<2x32xf32>
    %471 = arith.addf %470, %469 : vector<2x32xf32>
    %472 = arith.divf %470, %471 : vector<2x32xf32>
    %473 = arith.mulf %464, %413 : vector<2x32xf32>
    %474 = arith.mulf %458, %466 : vector<2x32xf32>
    %475 = arith.addf %473, %474 : vector<2x32xf32>
    %476 = math.tanh %475 : vector<2x32xf32>
    %477 = arith.mulf %472, %476 : vector<2x32xf32>
    %cst_124 = arith.constant dense<0.000000e+00> : vector<2x128xf32>
    %478 = tpu.matmul %477, %4, %cst_124 {dimension_numbers = #tpu.dot_dimension_numbers<[1], [0], [0], [1], [0, 0, 1, 1], [], []>} : vector<2x32xf32>, vector<32x128xf32>, vector<2x128xf32> -> vector<2x128xf32>
    %cst_125 = arith.constant dense<0.000000e+00> : vector<2x128xf32>
    %479 = tpu.matmul %445, %5, %cst_125 {dimension_numbers = #tpu.dot_dimension_numbers<[1], [0], [0], [1], [0, 0, 1, 1], [], []>} : vector<2x32xf32>, vector<32x128xf32>, vector<2x128xf32> -> vector<2x128xf32>
    %480 = arith.addf %478, %479 : vector<2x128xf32>
    %481 = vector.broadcast %6 : vector<1x128xf32> to vector<2x128xf32>
    %482 = arith.addf %480, %481 : vector<2x128xf32>
    %483 = vector.extract_strided_slice %482 {offsets = [0, 0], sizes = [2, 32], strides = [1, 1]} : vector<2x128xf32> to vector<2x32xf32>
    %484 = arith.negf %483 : vector<2x32xf32>
    %485 = math.exp %484 : vector<2x32xf32>
    %cst_126 = arith.constant 1.000000e+00 : f32
    %486 = vector.broadcast %cst_126 : f32 to vector<2x32xf32>
    %487 = arith.addf %486, %485 : vector<2x32xf32>
    %488 = arith.divf %486, %487 : vector<2x32xf32>
    %489 = vector.extract_strided_slice %482 {offsets = [0, 32], sizes = [2, 32], strides = [1, 1]} : vector<2x128xf32> to vector<2x32xf32>
    %490 = arith.negf %489 : vector<2x32xf32>
    %491 = math.exp %490 : vector<2x32xf32>
    %cst_127 = arith.constant 1.000000e+00 : f32
    %492 = vector.broadcast %cst_127 : f32 to vector<2x32xf32>
    %493 = arith.addf %492, %491 : vector<2x32xf32>
    %494 = arith.divf %492, %493 : vector<2x32xf32>
    %495 = vector.extract_strided_slice %482 {offsets = [0, 64], sizes = [2, 32], strides = [1, 1]} : vector<2x128xf32> to vector<2x32xf32>
    %496 = math.tanh %495 : vector<2x32xf32>
    %497 = vector.extract_strided_slice %482 {offsets = [0, 96], sizes = [2, 32], strides = [1, 1]} : vector<2x128xf32> to vector<2x32xf32>
    %498 = arith.negf %497 : vector<2x32xf32>
    %499 = math.exp %498 : vector<2x32xf32>
    %cst_128 = arith.constant 1.000000e+00 : f32
    %500 = vector.broadcast %cst_128 : f32 to vector<2x32xf32>
    %501 = arith.addf %500, %499 : vector<2x32xf32>
    %502 = arith.divf %500, %501 : vector<2x32xf32>
    %503 = arith.mulf %494, %443 : vector<2x32xf32>
    %504 = arith.mulf %488, %496 : vector<2x32xf32>
    %505 = arith.addf %503, %504 : vector<2x32xf32>
    %506 = math.tanh %505 : vector<2x32xf32>
    %507 = arith.mulf %502, %506 : vector<2x32xf32>
    %c7_129 = arith.constant 7 : index
    %c0_130 = arith.constant 0 : index
    %c0_131 = arith.constant 0 : index
    %508 = vector.load %arg8[%c7_129, %c0_130, %c0_131] : memref<8x2x32xf32, #tpu.memory_space<vmem>>, vector<1x2x32xf32>
    %509 = vector.shape_cast %508 : vector<1x2x32xf32> to vector<2x32xf32>
    %510 = vector.shape_cast %507 : vector<2x32xf32> to vector<1x2x32xf32>
    tpu.vector_store %arg8[%c7_129, %c0_130, %c0_131], %510 {strides = array<i32>} : memref<8x2x32xf32, #tpu.memory_space<vmem>>, vector<1x2x32xf32>,
    %c0_132 = arith.constant 0 : index
    %c0_133 = arith.constant 0 : index
    %c0_134 = arith.constant 0 : index
    %511 = vector.load %arg11[%c0_132, %c0_133, %c0_134] : memref<2x2x32xf32, #tpu.memory_space<vmem>>, vector<1x2x32xf32>
    %512 = vector.shape_cast %511 : vector<1x2x32xf32> to vector<2x32xf32>
    %513 = vector.shape_cast %477 : vector<2x32xf32> to vector<1x2x32xf32>
    tpu.vector_store %arg11[%c0_132, %c0_133, %c0_134], %513 {strides = array<i32>} : memref<2x2x32xf32, #tpu.memory_space<vmem>>, vector<1x2x32xf32>,
    %c0_135 = arith.constant 0 : index
    %c0_136 = arith.constant 0 : index
    %c0_137 = arith.constant 0 : index
    %514 = vector.load %arg12[%c0_135, %c0_136, %c0_137] : memref<2x2x32xf32, #tpu.memory_space<vmem>>, vector<1x2x32xf32>
    %515 = vector.shape_cast %514 : vector<1x2x32xf32> to vector<2x32xf32>
    %516 = vector.shape_cast %475 : vector<2x32xf32> to vector<1x2x32xf32>
    tpu.vector_store %arg12[%c0_135, %c0_136, %c0_137], %516 {strides = array<i32>} : memref<2x2x32xf32, #tpu.memory_space<vmem>>, vector<1x2x32xf32>,
    %c1_138 = arith.constant 1 : index
    %c0_139 = arith.constant 0 : index
    %c0_140 = arith.constant 0 : index
    %517 = vector.load %arg11[%c1_138, %c0_139, %c0_140] : memref<2x2x32xf32, #tpu.memory_space<vmem>>, vector<1x2x32xf32>
    %518 = vector.shape_cast %517 : vector<1x2x32xf32> to vector<2x32xf32>
    %519 = vector.shape_cast %507 : vector<2x32xf32> to vector<1x2x32xf32>
    tpu.vector_store %arg11[%c1_138, %c0_139, %c0_140], %519 {strides = array<i32>} : memref<2x2x32xf32, #tpu.memory_space<vmem>>, vector<1x2x32xf32>,
    %c1_141 = arith.constant 1 : index
    %c0_142 = arith.constant 0 : index
    %c0_143 = arith.constant 0 : index
    %520 = vector.load %arg12[%c1_141, %c0_142, %c0_143] : memref<2x2x32xf32, #tpu.memory_space<vmem>>, vector<1x2x32xf32>
    %521 = vector.shape_cast %520 : vector<1x2x32xf32> to vector<2x32xf32>
    %522 = vector.shape_cast %505 : vector<2x32xf32> to vector<1x2x32xf32>
    tpu.vector_store %arg12[%c1_141, %c0_142, %c0_143], %522 {strides = array<i32>} : memref<2x2x32xf32, #tpu.memory_space<vmem>>, vector<1x2x32xf32>,
    %c0_i32_144 = arith.constant 0 : i32
    %523 = arith.cmpi eq, %arg0, %c0_i32_144 : i32
    %524 = arith.extui %523 : i1 to i32
    %c0_i32_145 = arith.constant 0 : i32
    %525 = arith.cmpi ne, %524, %c0_i32_145 : i32
    scf.if %525 {
      %c0_146 = arith.constant 0 : index
      %c0_147 = arith.constant 0 : index
      %c0_148 = arith.constant 0 : index
      %526 = vector.load %arg11[%c0_146, %c0_147, %c0_148] : memref<2x2x32xf32, #tpu.memory_space<vmem>>, vector<2x2x32xf32>
      %c0_149 = arith.constant 0 : index
      %c0_150 = arith.constant 0 : index
      %c0_151 = arith.constant 0 : index
      %527 = vector.load %arg9[%c0_149, %c0_150, %c0_151] : memref<2x2x32xf32, #tpu.memory_space<vmem>>, vector<2x2x32xf32>
      tpu.vector_store %arg9[%c0_149, %c0_150, %c0_151], %526 {strides = array<i32>} : memref<2x2x32xf32, #tpu.memory_space<vmem>>, vector<2x2x32xf32>,
      %c0_152 = arith.constant 0 : index
      %c0_153 = arith.constant 0 : index
      %c0_154 = arith.constant 0 : index
      %528 = vector.load %arg12[%c0_152, %c0_153, %c0_154] : memref<2x2x32xf32, #tpu.memory_space<vmem>>, vector<2x2x32xf32>
      %c0_155 = arith.constant 0 : index
      %c0_156 = arith.constant 0 : index
      %c0_157 = arith.constant 0 : index
      %529 = vector.load %arg10[%c0_155, %c0_156, %c0_157] : memref<2x2x32xf32, #tpu.memory_space<vmem>>, vector<2x2x32xf32>
      tpu.vector_store %arg10[%c0_155, %c0_156, %c0_157], %528 {strides = array<i32>} : memref<2x2x32xf32, #tpu.memory_space<vmem>>, vector<2x2x32xf32>,
    } else {
    }
    return
  }
  func.func @transform_0(%arg0: i32) -> (i32, i32, i32) {
    %c0_i32 = arith.constant 0 : i32
    %c0_i32_0 = arith.constant 0 : i32
    %c0_i32_1 = arith.constant 0 : i32
    return %arg0, %c0_i32, %c0_i32_0 : i32, i32, i32
  }
  func.func @transform_1(%arg0: i32) -> (i32, i32, i32) {
    %c0_i32 = arith.constant 0 : i32
    %c0_i32_0 = arith.constant 0 : i32
    %c0_i32_1 = arith.constant 0 : i32
    %c0_i32_2 = arith.constant 0 : i32
    return %c0_i32, %c0_i32_0, %c0_i32_1 : i32, i32, i32
  }
  func.func @transform_2(%arg0: i32) -> (i32, i32, i32) {
    %c0_i32 = arith.constant 0 : i32
    %c0_i32_0 = arith.constant 0 : i32
    %c0_i32_1 = arith.constant 0 : i32
    %c0_i32_2 = arith.constant 0 : i32
    return %c0_i32, %c0_i32_0, %c0_i32_1 : i32, i32, i32
  }
  func.func @transform_3(%arg0: i32) -> (i32, i32) {
    %c0_i32 = arith.constant 0 : i32
    %c0_i32_0 = arith.constant 0 : i32
    %c0_i32_1 = arith.constant 0 : i32
    return %c0_i32, %c0_i32_0 : i32, i32
  }
  func.func @transform_4(%arg0: i32) -> (i32, i32) {
    %c0_i32 = arith.constant 0 : i32
    %c0_i32_0 = arith.constant 0 : i32
    %c0_i32_1 = arith.constant 0 : i32
    return %c0_i32, %c0_i32_0 : i32, i32
  }
  func.func @transform_5(%arg0: i32) -> (i32, i32) {
    %c0_i32 = arith.constant 0 : i32
    %c0_i32_0 = arith.constant 0 : i32
    %c0_i32_1 = arith.constant 0 : i32
    return %c0_i32, %c0_i32_0 : i32, i32
  }
  func.func @transform_6(%arg0: i32) -> (i32, i32) {
    %c0_i32 = arith.constant 0 : i32
    %c0_i32_0 = arith.constant 0 : i32
    %c0_i32_1 = arith.constant 0 : i32
    return %c0_i32, %c0_i32_0 : i32, i32
  }
  func.func @transform_7(%arg0: i32) -> (i32, i32, i32) {
    %c0_i32 = arith.constant 0 : i32
    %c0_i32_0 = arith.constant 0 : i32
    %c0_i32_1 = arith.constant 0 : i32
    return %arg0, %c0_i32, %c0_i32_0 : i32, i32, i32
  }
  func.func @transform_8(%arg0: i32) -> (i32, i32, i32) {
    %c0_i32 = arith.constant 0 : i32
    %c0_i32_0 = arith.constant 0 : i32
    %c0_i32_1 = arith.constant 0 : i32
    %c0_i32_2 = arith.constant 0 : i32
    return %c0_i32, %c0_i32_0, %c0_i32_1 : i32, i32, i32
  }
  func.func @transform_9(%arg0: i32) -> (i32, i32, i32) {
    %c0_i32 = arith.constant 0 : i32
    %c0_i32_0 = arith.constant 0 : i32
    %c0_i32_1 = arith.constant 0 : i32
    %c0_i32_2 = arith.constant 0 : i32
    return %c0_i32, %c0_i32_0, %c0_i32_1 : i32, i32, i32
  }
}

</mosaic_0001>

<bundles_post_ra>
// kernel: tpu_custom_call.1
= control target key start
LH: loop header
LB: loop body
LE: loop exit
PB: predicated region body
PF: predicated region fallthrough
CT: control target
= control target key end

     0   :  { %15 = vsyncpa [#allocation5], 0  ;;  %s3847_s0 = inlined_call_operand.hbm [shape: f32[8,2,128], index: 0, kind: input, shape index: {}]   ;;  %s3848_s1 = inlined_call_operand.hbm [shape: f32[2,2,32], index: 1, kind: input, shape index: {}]   ;;  %s3849_s2 = inlined_call_operand.vmem [shape: f32[2,2,32], index: 2, kind: input, shape index: {}]   ;;  %s3850_s3 = inlined_call_operand.hbm [shape: f32[32,128], index: 3, kind: input, shape index: {}]   ;;  %s3851_s4 = inlined_call_operand.hbm [shape: f32[32,128], index: 4, kind: input, shape index: {}]   ;;  %s3852_s5 = inlined_call_operand.hbm [shape: f32[32,128], index: 5, kind: input, shape index: {}]   ;;  %s3853_s6 = inlined_call_operand.vmem [shape: f32[1,128], index: 6, kind: input, shape index: {}]   ;;  %s3854_s7 = inlined_call_operand.hbm [shape: f32[8,2,32], index: 7, kind: output, shape index: {0}]   ;;  %s3855_s8 = inlined_call_operand.hbm [shape: f32[2,2,32], index: 8, kind: output, shape index: {1}]   ;;  %s3856_s9 = inlined_call_operand.hbm [shape: f32[2,2,32], index: 9, kind: output, shape index: {2}]  }
   0x1   :  { %16 = vsyncpa [#allocation8], 0 }
   0x2   :  { %17 = vsyncpa [#allocation11], 0 }
   0x3   :  { %18 = vsyncpa [#allocation6], 0 }
   0x4   :  { %19 = vsyncpa [#allocation15], 0  ;;  %s3323_s30 = smov [#allocation7]   ;;  %s3137_s13 = scalar_lea.hbm %s3848_s1, 64 }
   0x5   :  { %s37_s10 = sshll.u32 %s3323_s30, 4  ;;  %p3138_p0 = scmp.ne.s32.totalorder %s3848_s1, %s3137_s13  ;;  %s38_s10 = int_to_ptr.vmem [resolvable:$true] %s37_s10 }
   0x6   :  { %p3141_p1 = scmp.lt.u32.totalorder %s3137_s13, %s3848_s1 }
   0x8   :  { %p3143_p2 = pnand %p3141_p1, %p3138_p0 }
   0xa   :  { %3146 = shalt.err (!%p3143_p2)
}
   0xb   :  { %s3147_s18 = scalar_lea.vmem %s38_s10, 64  ;;  %p3152_p4 = scmp.lt.s32.totalorder %s38_s10, %s38_s10 }
   0xc   :  { %p3148_p3 = scmp.ne.s32.totalorder %s38_s10, %s3147_s18  ;;  %p3153_p5 = scmp.lt.s32.totalorder %s3147_s18, %s3147_s18 }
   0xe   :  { %p3154_p6 = por %p3153_p5, %p3152_p4 }
  0x10   :  { %p3155_p7 = pnand %p3154_p6, %p3148_p3 }
  0x12   :  { %3158 = shalt.err (!%p3155_p7)
}
  0x13   :  { %s3324_s19 = smov 32   ;;  %s3325_s20 = smov 2  }
  0x14   :  { %43 = dma.hbm_to_vmem [thread:$0]  %s3848_s1, 64, %s38_s10, [#allocation8], %s3324_s19, %s3324_s19, %s3325_s20  }
  0x15   :  { %s3326_s23 = smov [#allocation10]   ;;  %s3327_s25 = smov [#allocation4]  }
  0x16   :  { %s63_s24 = sshll.u32 %s3326_s23, 4  ;;  %s25_s26 = sshll.u32 %s3327_s25, 4  ;;  %s64_s24 = int_to_ptr.vmem [resolvable:$true] %s63_s24  ;;  %s26_s26 = int_to_ptr.vmem [resolvable:$true] %s25_s26 }
  0x17   :  { %s3159_s29 = scalar_lea.hbm %s3851_s4, 512 }
  0x18   :  { %p3160_p8 = scmp.ne.s32.totalorder %s3851_s4, %s3159_s29  ;;  %p3163_p9 = scmp.lt.u32.totalorder %s3159_s29, %s3851_s4 }
  0x1a   :  { %p3165_p10 = pnand %p3163_p9, %p3160_p8 }
  0x1c   :  { %3168 = shalt.err (!%p3165_p10)
}
  0x1d   :  { %s3169_s1 = scalar_lea.vmem %s64_s24, 512  ;;  %p3174_p12 = scmp.lt.s32.totalorder %s64_s24, %s64_s24 }
  0x1e   :  { %p3170_p11 = scmp.ne.s32.totalorder %s64_s24, %s3169_s1  ;;  %p3175_p13 = scmp.lt.s32.totalorder %s3169_s1, %s3169_s1 }
  0x20   :  { %p3176_p0 = por %p3175_p13, %p3174_p12 }
  0x22   :  { %p3177_p1 = pnand %p3176_p0, %p3170_p11 }
  0x24   :  { %3180 = shalt.err (!%p3177_p1)
}
  0x25   :  { %s3328_s10 = smov 128   ;;  %s3329_s14 = smov 8  }
  0x26   :  { %69 = dma.hbm_to_vmem [thread:$0]  %s3851_s4, 512, %s64_s24, [#allocation11], %s3328_s10, %s3328_s10, %s3329_s14  }
  0x27   :  { %s3181_s21 = scalar_lea.hbm %s3847_s0, 256 }
  0x28   :  { %p3182_p2 = scmp.ne.s32.totalorder %s3847_s0, %s3181_s21  ;;  %p3185_p3 = scmp.lt.u32.totalorder %s3181_s21, %s3847_s0 }
  0x2a   :  { %p3187_p4 = pnand %p3185_p3, %p3182_p2 }
  0x2c   :  { %3190 = shalt.err (!%p3187_p4)
}
  0x2d   :  { %s3191_s28 = scalar_lea.vmem %s26_s26, 256  ;;  %p3196_p6 = scmp.lt.s32.totalorder %s26_s26, %s26_s26 }
  0x2e   :  { %p3192_p5 = scmp.ne.s32.totalorder %s26_s26, %s3191_s28  ;;  %p3197_p7 = scmp.lt.s32.totalorder %s3191_s28, %s3191_s28 }
  0x30   :  { %p3198_p8 = por %p3197_p7, %p3196_p6 }
  0x32   :  { %p3199_p9 = pnand %p3198_p8, %p3192_p5 }
  0x34   :  { %3202 = shalt.err (!%p3199_p9)
}
  0x35   :  { %31 = dma.hbm_to_vmem [thread:$0]  %s3847_s0, 256, %s26_s26, [#allocation5], %s3324_s19, %s3324_s19, %s3325_s20  }
  0x36   :  { %s3330_s29 = smov [#allocation9]   ;;  %s3331_s11 = smov [#allocation12]  }
  0x37   :  { %s51_s30 = sshll.u32 %s3330_s29, 4  ;;  %s75_s12 = sshll.u32 %s3331_s11, 4  ;;  %s52_s30 = int_to_ptr.vmem [resolvable:$true] %s51_s30  ;;  %s76_s12 = int_to_ptr.vmem [resolvable:$true] %s75_s12 }
  0x38   :  { %s3203_s15 = scalar_lea.hbm %s3850_s3, 512 }
  0x39   :  { %p3204_p10 = scmp.ne.s32.totalorder %s3850_s3, %s3203_s15  ;;  %p3207_p11 = scmp.lt.u32.totalorder %s3203_s15, %s3850_s3 }
  0x3b   :  { %p3209_p12 = pnand %p3207_p11, %p3204_p10 }
  0x3d   :  { %3212 = shalt.err (!%p3209_p12)
}
  0x3e   :  { %s3213_s0 = scalar_lea.vmem %s52_s30, 512  ;;  %p3218_p0 = scmp.lt.s32.totalorder %s52_s30, %s52_s30 }
  0x3f   :  { %p3214_p13 = scmp.ne.s32.totalorder %s52_s30, %s3213_s0  ;;  %p3219_p1 = scmp.lt.s32.totalorder %s3213_s0, %s3213_s0 }
  0x41   :  { %p3220_p2 = por %p3219_p1, %p3218_p0 }
  0x43   :  { %p3221_p3 = pnand %p3220_p2, %p3214_p13 }
  0x45   :  { %3224 = shalt.err (!%p3221_p3)
}
  0x46   :  { %57 = dma.hbm_to_vmem [thread:$0]  %s3850_s3, 512, %s52_s30, [#allocation8], %s3328_s10, %s3328_s10, %s3329_s14  }
  0x47   :  { %s3225_s27 = scalar_lea.hbm %s3852_s5, 512 }
  0x48   :  { %p3226_p4 = scmp.ne.s32.totalorder %s3852_s5, %s3225_s27  ;;  %p3229_p5 = scmp.lt.u32.totalorder %s3225_s27, %s3852_s5 }
  0x4a   :  { %p3231_p6 = pnand %p3229_p5, %p3226_p4 }
  0x4c   :  { %3234 = shalt.err (!%p3231_p6)
}
  0x4d   :  { %s3235_s11 = scalar_lea.vmem %s76_s12, 512  ;;  %p3240_p8 = scmp.lt.s32.totalorder %s76_s12, %s76_s12 }
  0x4e   :  { %p3236_p7 = scmp.ne.s32.totalorder %s76_s12, %s3235_s11  ;;  %p3241_p9 = scmp.lt.s32.totalorder %s3235_s11, %s3235_s11 }
  0x50   :  { %p3242_p10 = por %p3241_p9, %p3240_p8 }
  0x52   :  { %p3243_p11 = pnand %p3242_p10, %p3236_p7 }
  0x54   :  { %3246 = shalt.err (!%p3243_p11)
}
  0x55   :  { %81 = dma.hbm_to_vmem [thread:$0]  %s3852_s5, 512, %s76_s12, [#allocation11], %s3328_s10, %s3328_s10, %s3329_s14  }
  0x56   :  { %3313 = dma.done.wait [#allocation5], 256  }
  0x57   :  { %3314 = vsyncadd [#allocation5], 4294967040 }
  0x58   :  { %3315 = dma.done.wait [#allocation8], 576  }
  0x59   :  { %3316 = vsyncadd [#allocation8], 4294966720 }
  0x5a   :  { %3317 = dma.done.wait [#allocation11], 1024  }
  0x5b   :  { %3318 = vsyncadd [#allocation11], 4294966272  ;;  %v3332_v0 = vmov 0.0|0.0   ;;  %vm3333_vm0 = vmmov 0   ;;  %v3334_v1 = vmov 0.0   ;;  %vm105_vm1 = vcmask 254976  }
  0x5c   :  { %2848 = vmatprep.subr.bf16.mxu0 %v3332_v0  ;;  %2592 = vmatprep.mubr.msk.f32.mxu0 %vm3333_vm0, %v3334_v1  ;;  %v112_v2 = vld [vmem:[#allocation9] sm:$0xff]  ;;  %v113_v3 = vld [vmem:[#allocation9 + $0x8] sm:$0xff]  ;;  %v114_v4 = vld [vmem:[#allocation9 + $0x10] sm:$0xff]  ;;  %vm132_vm2 = vcmask 261120   ;;  %s3335_s14 = smov 64  }
  0x5d   :  { %2854 = vmatprep.subr.bf16.mxu1 %v3332_v0  ;;  %2603 = vmatprep.mubr.msk.f32.mxu1 %vm3333_vm0, %v3334_v1  ;;  %v3471_v5 = vpack.c.bf16 %v113_v3, %v112_v2  ;;  %v115_v6 = vld [vmem:[#allocation9 + $0x18] sm:$0xff]  ;;  %v108_v10 = vld [vmem:[%s3849_s2] sm:$0x3]  ;;  %v131_v11 = vld [vmem:[#allocation4] sm:$0x3] }
  0x5e   :  { %v103_v7 = vld [vmem:[#allocation7] sm:$0x3]  ;;  %v3475_v8 = vpack.c.bf16 %v115_v6, %v114_v4  ;;  %110 = vst.msk [vmem:[#allocation3] sm:$0x3] %vm105_vm1, %v108_v10  ;;  %v120_v27 = vld [vmem:[#allocation12] sm:$0xff]  ;;  %v121_v28 = vld [vmem:[#allocation12 + $0x8] sm:$0xff] }
  0x5f   :  { %106 = vst.msk [vmem:[#allocation2] sm:$0x3] %vm105_vm1, %v103_v7  ;;  %2850 = vmatpush3.bf16.msra.mxu0 %v3471_v5  ;;  %v122_v29 = vld [vmem:[#allocation12 + $0x10] sm:$0xff]  ;;  %v3493_v30 = vpack.c.bf16 %v121_v28, %v120_v27  ;;  %v123_v31 = vld [vmem:[#allocation12 + $0x18] sm:$0xff]  ;;  %v116_v33 = vld [vmem:[#allocation10] sm:$0xff] }
  0x60   :  { %2851 = vmatprep.subr.bf16.mxu0 %v3332_v0  ;;  %v104_v32 = vld [vmem:[#allocation7 + $0x2] sm:$0x3]  ;;  %v117_v34 = vld [vmem:[#allocation10 + $0x8] sm:$0xff]  ;;  %v118_v35 = vld [vmem:[#allocation10 + $0x10] sm:$0xff]  ;;  %v3497_v37 = vpack.c.bf16 %v123_v31, %v122_v29 }
  0x61   :  { %107 = vst.msk [vmem:[#allocation2 + $0x2] sm:$0x3] %vm105_vm1, %v104_v32  ;;  %v119_v36 = vld [vmem:[#allocation10 + $0x18] sm:$0xff]  ;;  %2856 = vmatpush3.bf16.msra.mxu1 %v3493_v30  ;;  %v3499_v38 = vpack.c.bf16 %v117_v34, %v116_v33  ;;  %v109_v47 = vld [vmem:[%s3849_s2 + $0x2] sm:$0x3]  ;;  %s3336_s2 = smov 96  }
  0x62   :  { %2857 = vmatprep.subr.bf16.mxu1 %v3332_v0  ;;  %v3503_v39 = vpack.c.bf16 %v119_v36, %v118_v35  ;;  %111 = vst.msk [vmem:[#allocation3 + $0x2] sm:$0x3] %vm105_vm1, %v109_v47  ;;  %v425_v48 = vld [vmem:[#allocation4 + $0x2] sm:$0x3]  ;;  %v3540_v49 = vld [vmem:[%s3853_s6] ss:$0 sm:$0xff] }
  0x63   :  { %2853 = vmatpush3.bf16.msra.mxu0 %v3475_v8  ;;  %v700_v34 = vld [vmem:[#allocation4 + $0x4] sm:$0x3]  ;;  %s3337_s6 = smov [#allocation13]  }
  0x64   :  { %2860 = vmatprep.subr.bf16.mxu0 %v3332_v0  ;;  %s2378_s16 = sshll.u32 %s3337_s6, 4  ;;  %s2379_s16 = int_to_ptr.vmem [resolvable:$true] %s2378_s16 }
  0x65   :  { %v126_v16 = vld [vmem:[#allocation3] sm:$0x3]  ;;  %2859 = vmatpush3.bf16.msra.mxu1 %v3497_v37  ;;  %s3247_s17 = scalar_lea.vmem %s2379_s16, 256  ;;  %p3252_p13 = scmp.lt.s32.totalorder %s2379_s16, %s2379_s16 }
  0x66   :  { %v125_v9 = vld [vmem:[#allocation2] sm:$0x3]  ;;  %2866 = vmatprep.subr.bf16.mxu1 %v3332_v0  ;;  %p3248_p12 = scmp.ne.s32.totalorder %s2379_s16, %s3247_s17  ;;  %p3253_p0 = scmp.lt.s32.totalorder %s3247_s17, %s3247_s17 }
  0x67   :  { %2593 = vmatmul.mubr.msk.f32.vlgmr.msra.gmra.mrb[0].mxu0 %vm132_vm2, %v125_v9 }
  0x68   :  { %2614 = vmatprep.mubr.msk.f32.mxu0 %vm3333_vm0, %v3334_v1  ;;  %2862 = vmatpush3.bf16.msra.mxu0 %v3499_v38  ;;  %v128_v40 = vld [vmem:[#allocation2 + $0x2] sm:$0x3]  ;;  %p3254_p1 = por %p3253_p0, %p3252_p13 }
  0x69   :  { %2863 = vmatprep.subr.bf16.mxu0 %v3332_v0  ;;  %2604 = vmatmul.mubr.msk.f32.vlgmr.msra.gmra.mrb[0].mxu1 %vm132_vm2, %v128_v40  ;;  %v130_v59 = vld [vmem:[#allocation3 + $0x2] sm:$0x3] }
  0x6a   :  { %2868 = vmatpush3.bf16.msra.mxu1 %v3471_v5  ;;  %2625 = vmatprep.mubr.msk.f32.mxu1 %vm3333_vm0, %v3334_v1  ;;  %p3255_p2 = pnand %p3254_p1, %p3248_p12 }
  0x6b   :  { %2869 = vmatprep.subr.bf16.mxu1 %v3332_v0 }
  0x6c   :  { %2865 = vmatpush3.bf16.msra.mxu0 %v3503_v39 }
  0x6d   :  { %2872 = vmatprep.subr.bf16.mxu0 %v3332_v0 }
  0x6e   :  { %2871 = vmatpush3.bf16.msra.mxu1 %v3475_v8 }
  0x6f   :  { %2878 = vmatprep.subr.bf16.mxu1 %v3332_v0 }
 0x13a   :  { %v202_v12 = vpop.f32.mrb[0].mxu0 }
 0x13b   :  { %v206_v13 = vadd.f32 %v202_v12, %v131_v11  ;;  %v2594_v14 = vpop.f32.mrb[1].mxu0 }
 0x13c   :  { %v304_v44 = vpop.f32.mrb[0].mxu1 }
 0x13d   :  { %3009 = vtanh.f32 %v206_v13  ;;  %v2424_v17 = vmul.f32 -1.442695, %v206_v13  ;;  %v2605_v45 = vpop.f32.mrb[1].mxu1 }
 0x13f   :  { %3011 = vpow2.f32 %v2424_v17 }
 0x147   :  { %v3010_v15 = vpop.eup %3009 }
 0x148   :  { %220 = vrot.lane.b32.xlu0 %v3010_v15, %s3335_s14 }
 0x149   :  { %v3012_v18 = vpop.eup %3011 }
 0x14a   :  { %v210_v19 = vadd.f32 1.0, %v3012_v18 }
 0x14c   :  { %215 = vrot.lane.b32.xlu0 %v126_v16, %s3324_s19  ;;  %3013 = vrcp.f32 %v210_v19 }
 0x156   :  { %v3014_v20 = vpop.eup %3013 }
 0x1ba   :  { %v221_v21 = vpop.permute.xlu0 %220 }
 0x1bb   :  { %v223_v22 = vmul.f32 %v3014_v20, %v221_v21 }
 0x1bd   :  { %225 = vrot.lane.b32.xlu1 %v223_v22, %s3324_s19 }
 0x1be   :  { %v216_v23 = vpop.permute.xlu0 %215 }
 0x1bf   :  { %v218_v24 = vmul.f32 %v3014_v20, %v216_v23 }
 0x22f   :  { %v226_v25 = vpop.permute.xlu1 %225 }
 0x230   :  { %v3490_v26 = vadd.f32 %v226_v25, %v218_v24 }
 0x232   :  { %3015 = vtanh.f32 %v3490_v26 }
 0x23c   :  { %v3016_v41 = vpop.eup %3015 }
 0x23d   :  { %231 = vrot.lane.b32.xlu1 %v3016_v41, %s3335_s14 }
 0x2af   :  { %v232_v42 = vpop.permute.xlu1 %231 }
 0x2b0   :  { %v234_v43 = vmul.f32 %v3014_v20, %v232_v42 }
 0x2b2   :  { %309 = vrot.lane.b32.xlu0 %v234_v43, %s3324_s19 }
 0x324   :  { %v310_v46 = vpop.permute.xlu0 %309 }
 0x325   :  { %2615 = vmatmul.mubr.msk.f32.vlgmr.msra.gmra.mrb[2].mxu0 %vm132_vm2, %v310_v46  ;;  %2626 = vmatmul.mubr.msk.f32.vlgmr.msra.gmra.mrb[2].mxu1 %vm132_vm2, %v310_v46 }
 0x326   :  { %2880 = vmatpush3.bf16.msra.mxu1 %v3499_v38  ;;  %2874 = vmatpush3.bf16.msra.mxu0 %v3493_v30 }
 0x327   :  { %2881 = vmatprep.subr.bf16.mxu1 %v3332_v0  ;;  %2875 = vmatprep.subr.bf16.mxu0 %v3332_v0 }
 0x328   :  { %2647 = vmatprep.mubr.msk.f32.mxu1 %vm3333_vm0, %v3334_v1  ;;  %2636 = vmatprep.mubr.msk.f32.mxu0 %vm3333_vm0, %v3334_v1 }
 0x32a   :  { %2883 = vmatpush3.bf16.msra.mxu1 %v3503_v39  ;;  %2877 = vmatpush3.bf16.msra.mxu0 %v3497_v37 }
 0x32b   :  { %2884 = vmatprep.subr.bf16.mxu0 %v3332_v0  ;;  %2890 = vmatprep.subr.bf16.mxu1 %v3332_v0 }
 0x3f8   :  { %v379_v50 = vpop.f32.mrb[2].mxu0  ;;  %v492_v51 = vpop.f32.mrb[2].mxu1 }
 0x3f9   :  { %v380_v52 = vadd.f32 %v379_v50, %v304_v44  ;;  %v496_v53 = vadd.f32 %v492_v51, %v425_v48  ;;  %v2616_v54 = vpop.f32.mrb[3].mxu0  ;;  %v2627_v55 = vpop.f32.mrb[3].mxu1 }
 0x3fb   :  { %v389_v56 = vadd.f32 %v3540_v49, %v380_v52  ;;  %3017 = vtanh.f32 %v496_v53  ;;  %v2430_v60 = vmul.f32 -1.442695, %v496_v53 }
 0x3fd   :  { %3019 = vtanh.f32 %v389_v56  ;;  %v2428_v61 = vmul.f32 -1.442695, %v389_v56 }
 0x3fe   :  { %3021 = vpow2.f32 %v2430_v60 }
 0x3ff   :  { %3023 = vpow2.f32 %v2428_v61 }
 0x405   :  { %v3018_v57 = vpop.eup %3017 }
 0x406   :  { %506 = vrot.lane.b32.xlu0 %v3018_v57, %s3335_s14 }
 0x407   :  { %v3020_v58 = vpop.eup %3019 }
 0x408   :  { %403 = vrot.lane.b32.xlu1 %v3020_v58, %s3335_s14  ;;  %v3022_v62 = vpop.eup %3021 }
 0x409   :  { %v3024_v63 = vpop.eup %3023  ;;  %v500_v2 = vadd.f32 1.0, %v3022_v62 }
 0x40a   :  { %v393_v3 = vadd.f32 1.0, %v3024_v63 }
 0x40b   :  { %3025 = vrcp.f32 %v500_v2 }
 0x40c   :  { %398 = vrot.lane.b32.xlu1 %v130_v59, %s3324_s19  ;;  %3027 = vrcp.f32 %v393_v3 }
 0x415   :  { %v3026_v4 = vpop.eup %3025 }
 0x416   :  { %v3028_v9 = vpop.eup %3027  ;;  %v504_v13 = vmul.f32 %v3026_v4, %v3490_v26 }
 0x478   :  { %v507_v6 = vpop.permute.xlu0 %506 }
 0x479   :  { %v509_v7 = vmul.f32 %v3026_v4, %v507_v6 }
 0x47a   :  { %v404_v10 = vpop.permute.xlu1 %403 }
 0x47b   :  { %v406_v11 = vmul.f32 %v3028_v9, %v404_v10  ;;  %511 = vrot.lane.b32.xlu1 %v509_v7, %s3324_s19 }
 0x47d   :  { %408 = vrot.lane.b32.xlu0 %v406_v11, %s3324_s19 }
 0x47e   :  { %v399_v12 = vpop.permute.xlu1 %398 }
 0x47f   :  { %v401_v15 = vmul.f32 %v3028_v9, %v399_v12 }
 0x4ed   :  { %v512_v14 = vpop.permute.xlu1 %511 }
 0x4ee   :  { %v3549_v16 = vadd.f32 %v512_v14, %v504_v13  ;;  %v975_v13 = vld [vmem:[#allocation4 + $0x6] sm:$0x3] }
 0x4ef   :  { %v409_v17 = vpop.permute.xlu0 %408 }
 0x4f0   :  { %3029 = vtanh.f32 %v3549_v16  ;;  %v3552_v18 = vadd.f32 %v409_v17, %v401_v15 }
 0x4f2   :  { %3031 = vtanh.f32 %v3552_v18 }
 0x4fa   :  { %v3030_v19 = vpop.eup %3029 }
 0x4fb   :  { %517 = vrot.lane.b32.xlu1 %v3030_v19, %s3335_s14 }
 0x4fc   :  { %v3032_v20 = vpop.eup %3031 }
 0x4fd   :  { %414 = vrot.lane.b32.xlu0 %v3032_v20, %s3335_s14 }
 0x56d   :  { %v518_v21 = vpop.permute.xlu1 %517 }
 0x56e   :  { %v520_v22 = vmul.f32 %v3026_v4, %v518_v21 }
 0x56f   :  { %v415_v23 = vpop.permute.xlu0 %414 }
 0x570   :  { %v417_v24 = vmul.f32 %v3028_v9, %v415_v23  ;;  %594 = vrot.lane.b32.xlu1 %v520_v22, %s3324_s19 }
 0x572   :  { %419 = vrot.lane.b32.xlu0 %v417_v24, %s3324_s19 }
 0x5e2   :  { %v595_v25 = vpop.permute.xlu1 %594 }
 0x5e3   :  { %2648 = vmatmul.mubr.msk.f32.vlgmr.msra.gmra.mrb[4].mxu1 %vm132_vm2, %v595_v25 }
 0x5e4   :  { %v420_v26 = vpop.permute.xlu0 %419  ;;  %2892 = vmatpush3.bf16.msra.mxu1 %v3493_v30  ;;  %2669 = vmatprep.mubr.msk.f32.mxu1 %vm3333_vm0, %v3334_v1 }
 0x5e5   :  { %423 = vst.msk [vmem:[#allocation13] sm:$0x3] %vm105_vm1, %v420_v26  ;;  %2637 = vmatmul.mubr.msk.f32.vlgmr.msra.gmra.mrb[4].mxu0 %vm132_vm2, %v420_v26  ;;  %2893 = vmatprep.subr.bf16.mxu1 %v3332_v0 }
 0x5e6   :  { %2886 = vmatpush3.bf16.msra.mxu0 %v3471_v5  ;;  %2658 = vmatprep.mubr.msk.f32.mxu0 %vm3333_vm0, %v3334_v1 }
 0x5e7   :  { %2887 = vmatprep.subr.bf16.mxu0 %v3332_v0 }
 0x5e8   :  { %2895 = vmatpush3.bf16.msra.mxu1 %v3497_v37 }
 0x5e9   :  { %2902 = vmatprep.subr.bf16.mxu1 %v3332_v0 }
 0x5ea   :  { %2889 = vmatpush3.bf16.msra.mxu0 %v3475_v8 }
 0x5eb   :  { %2896 = vmatprep.subr.bf16.mxu0 %v3332_v0 }
 0x5ed   :  { %2659 = vmatmul.mubr.msk.f32.vlgmr.msra.gmra.mrb[6].mxu0 %vm132_vm2, %v595_v25 }
 0x5ee   :  { %2898 = vmatpush3.bf16.msra.mxu0 %v3499_v38  ;;  %2680 = vmatprep.mubr.msk.f32.mxu0 %vm3333_vm0, %v3334_v1 }
 0x5ef   :  { %2899 = vmatprep.subr.bf16.mxu0 %v3332_v0 }
 0x5f2   :  { %2901 = vmatpush3.bf16.msra.mxu0 %v3503_v39 }
 0x5f3   :  { %2908 = vmatprep.subr.bf16.mxu0 %v3332_v0 }
 0x6b6   :  { %v664_v27 = vpop.f32.mrb[4].mxu1 }
 0x6b7   :  { %v2649_v28 = vpop.f32.mrb[5].mxu1 }
 0x6b8   :  { %v589_v29 = vpop.f32.mrb[4].mxu0 }
 0x6b9   :  { %v665_v31 = vadd.f32 %v664_v27, %v589_v29  ;;  %v2638_v32 = vpop.f32.mrb[5].mxu0 }
 0x6bb   :  { %v668_v33 = vadd.f32 %v3540_v49, %v665_v31 }
 0x6bd   :  { %3033 = vtanh.f32 %v668_v33  ;;  %v2433_v43 = vmul.f32 -1.442695, %v668_v33 }
 0x6c0   :  { %v767_v35 = vpop.f32.mrb[6].mxu0 }
 0x6c1   :  { %v771_v36 = vadd.f32 %v767_v35, %v700_v34  ;;  %v2660_v40 = vpop.f32.mrb[7].mxu0 }
 0x6c3   :  { %3035 = vtanh.f32 %v771_v36  ;;  %v2435_v44 = vmul.f32 -1.442695, %v771_v36 }
 0x6c4   :  { %3037 = vpow2.f32 %v2433_v43 }
 0x6c5   :  { %3039 = vpow2.f32 %v2435_v44 }
 0x6c7   :  { %v3034_v41 = vpop.eup %3033 }
 0x6c8   :  { %678 = vrot.lane.b32.xlu0 %v3034_v41, %s3335_s14 }
 0x6cd   :  { %v3036_v42 = vpop.eup %3035 }
 0x6ce   :  { %781 = vrot.lane.b32.xlu1 %v3036_v42, %s3335_s14  ;;  %v3038_v45 = vpop.eup %3037 }
 0x6cf   :  { %v672_v46 = vadd.f32 1.0, %v3038_v45  ;;  %v3040_v47 = vpop.eup %3039 }
 0x6d0   :  { %v775_v48 = vadd.f32 1.0, %v3040_v47 }
 0x6d1   :  { %3041 = vrcp.f32 %v672_v46 }
 0x6d2   :  { %3043 = vrcp.f32 %v775_v48 }
 0x6db   :  { %v3042_v50 = vpop.eup %3041 }
 0x6dc   :  { %v3044_v53 = vpop.eup %3043  ;;  %v676_v56 = vmul.f32 %v3042_v50, %v3552_v18 }
 0x6dd   :  { %v779_v59 = vmul.f32 %v3044_v53, %v3549_v16 }
 0x73a   :  { %v679_v51 = vpop.permute.xlu0 %678 }
 0x73b   :  { %v681_v52 = vmul.f32 %v3042_v50, %v679_v51 }
 0x73d   :  { %683 = vrot.lane.b32.xlu0 %v681_v52, %s3324_s19 }
 0x740   :  { %v782_v54 = vpop.permute.xlu1 %781 }
 0x741   :  { %v784_v55 = vmul.f32 %v3044_v53, %v782_v54 }
 0x743   :  { %786 = vrot.lane.b32.xlu1 %v784_v55, %s3324_s19 }
 0x7af   :  { %v684_v57 = vpop.permute.xlu0 %683 }
 0x7b0   :  { %v3587_v58 = vadd.f32 %v684_v57, %v676_v56 }
 0x7b2   :  { %3045 = vtanh.f32 %v3587_v58 }
 0x7b5   :  { %v787_v60 = vpop.permute.xlu1 %786 }
 0x7b6   :  { %v3591_v61 = vadd.f32 %v787_v60, %v779_v59  ;;  %v1250_v59 = vld [vmem:[#allocation4 + $0x8] sm:$0x3] }
 0x7b8   :  { %3047 = vtanh.f32 %v3591_v61 }
 0x7bc   :  { %v3046_v62 = vpop.eup %3045 }
 0x7bd   :  { %689 = vrot.lane.b32.xlu0 %v3046_v62, %s3335_s14 }
 0x7c2   :  { %v3048_v63 = vpop.eup %3047 }
 0x7c3   :  { %792 = vrot.lane.b32.xlu1 %v3048_v63, %s3335_s14 }
 0x82f   :  { %v690_v2 = vpop.permute.xlu0 %689 }
 0x830   :  { %v692_v3 = vmul.f32 %v3042_v50, %v690_v2 }
 0x832   :  { %694 = vrot.lane.b32.xlu0 %v692_v3, %s3324_s19 }
 0x835   :  { %v793_v4 = vpop.permute.xlu1 %792 }
 0x836   :  { %v795_v6 = vmul.f32 %v3044_v53, %v793_v4 }
 0x838   :  { %869 = vrot.lane.b32.xlu1 %v795_v6, %s3324_s19 }
 0x8a4   :  { %v695_v7 = vpop.permute.xlu0 %694 }
 0x8a5   :  { %698 = vst.msk [vmem:[#allocation13 + $0x2] sm:$0x3] %vm105_vm1, %v695_v7  ;;  %2670 = vmatmul.mubr.msk.f32.vlgmr.msra.gmra.mrb[6].mxu1 %vm132_vm2, %v695_v7 }
 0x8a6   :  { %2904 = vmatpush3.bf16.msra.mxu1 %v3471_v5  ;;  %2691 = vmatprep.mubr.msk.f32.mxu1 %vm3333_vm0, %v3334_v1 }
 0x8a7   :  { %2905 = vmatprep.subr.bf16.mxu1 %v3332_v0 }
 0x8aa   :  { %2907 = vmatpush3.bf16.msra.mxu1 %v3475_v8  ;;  %v870_v9 = vpop.permute.xlu1 %869 }
 0x8ab   :  { %2681 = vmatmul.mubr.msk.f32.vlgmr.msra.gmra.mrb[8].mxu0 %vm132_vm2, %v870_v9  ;;  %2914 = vmatprep.subr.bf16.mxu1 %v3332_v0 }
 0x8ac   :  { %2910 = vmatpush3.bf16.msra.mxu0 %v3493_v30  ;;  %2702 = vmatprep.mubr.msk.f32.mxu0 %vm3333_vm0, %v3334_v1 }
 0x8ad   :  { %2692 = vmatmul.mubr.msk.f32.vlgmr.msra.gmra.mrb[8].mxu1 %vm132_vm2, %v870_v9  ;;  %2911 = vmatprep.subr.bf16.mxu0 %v3332_v0 }
 0x8ae   :  { %2916 = vmatpush3.bf16.msra.mxu1 %v3499_v38  ;;  %2713 = vmatprep.mubr.msk.f32.mxu1 %vm3333_vm0, %v3334_v1 }
 0x8af   :  { %2917 = vmatprep.subr.bf16.mxu1 %v3332_v0 }
 0x8b0   :  { %2913 = vmatpush3.bf16.msra.mxu0 %v3497_v37 }
 0x8b1   :  { %2920 = vmatprep.subr.bf16.mxu0 %v3332_v0 }
 0x8b2   :  { %2919 = vmatpush3.bf16.msra.mxu1 %v3503_v39 }
 0x8b3   :  { %2926 = vmatprep.subr.bf16.mxu1 %v3332_v0 }
 0x978   :  { %v864_v10 = vpop.f32.mrb[6].mxu1 }
 0x979   :  { %v2671_v11 = vpop.f32.mrb[7].mxu1 }
 0x97e   :  { %v939_v12 = vpop.f32.mrb[8].mxu0 }
 0x97f   :  { %v940_v14 = vadd.f32 %v939_v12, %v864_v10  ;;  %v2682_v15 = vpop.f32.mrb[9].mxu0 }
 0x980   :  { %v1042_v16 = vpop.f32.mrb[8].mxu1 }
 0x981   :  { %v943_v17 = vadd.f32 %v3540_v49, %v940_v14  ;;  %v1046_v18 = vadd.f32 %v1042_v16, %v975_v13  ;;  %v2693_v19 = vpop.f32.mrb[9].mxu1 }
 0x983   :  { %3049 = vtanh.f32 %v943_v17  ;;  %v2438_v22 = vmul.f32 -1.442695, %v943_v17  ;;  %v2440_v23 = vmul.f32 -1.442695, %v1046_v18 }
 0x984   :  { %3051 = vtanh.f32 %v1046_v18 }
 0x985   :  { %3053 = vpow2.f32 %v2438_v22 }
 0x986   :  { %3055 = vpow2.f32 %v2440_v23 }
 0x98d   :  { %v3050_v20 = vpop.eup %3049 }
 0x98e   :  { %v3052_v21 = vpop.eup %3051  ;;  %953 = vrot.lane.b32.xlu0 %v3050_v20, %s3335_s14 }
 0x98f   :  { %1056 = vrot.lane.b32.xlu1 %v3052_v21, %s3335_s14  ;;  %v3054_v24 = vpop.eup %3053 }
 0x990   :  { %v3056_v25 = vpop.eup %3055  ;;  %v947_v26 = vadd.f32 1.0, %v3054_v24 }
 0x991   :  { %v1050_v27 = vadd.f32 1.0, %v3056_v25 }
 0x992   :  { %3057 = vrcp.f32 %v947_v26 }
 0x993   :  { %3059 = vrcp.f32 %v1050_v27 }
 0x99c   :  { %v3058_v28 = vpop.eup %3057 }
 0x99d   :  { %v3060_v31 = vpop.eup %3059  ;;  %v951_v35 = vmul.f32 %v3058_v28, %v3587_v58 }
 0x99e   :  { %v1054_v36 = vmul.f32 %v3060_v31, %v3591_v61 }
 0xa00   :  { %v954_v29 = vpop.permute.xlu0 %953 }
 0xa01   :  { %v1057_v32 = vpop.permute.xlu1 %1056  ;;  %v956_v33 = vmul.f32 %v3058_v28, %v954_v29 }
 0xa02   :  { %v1059_v34 = vmul.f32 %v3060_v31, %v1057_v32 }
 0xa03   :  { %958 = vrot.lane.b32.xlu0 %v956_v33, %s3324_s19 }
 0xa04   :  { %1061 = vrot.lane.b32.xlu1 %v1059_v34, %s3324_s19 }
 0xa75   :  { %v959_v40 = vpop.permute.xlu0 %958 }
 0xa76   :  { %v1062_v41 = vpop.permute.xlu1 %1061  ;;  %v3627_v42 = vadd.f32 %v959_v40, %v951_v35  ;;  %v1525_v40 = vld [vmem:[#allocation4 + $0xa] sm:$0x3] }
 0xa77   :  { %v3629_v43 = vadd.f32 %v1062_v41, %v1054_v36 }
 0xa78   :  { %3061 = vtanh.f32 %v3627_v42 }
 0xa79   :  { %3063 = vtanh.f32 %v3629_v43 }
 0xa82   :  { %v3062_v44 = vpop.eup %3061 }
 0xa83   :  { %v3064_v45 = vpop.eup %3063  ;;  %964 = vrot.lane.b32.xlu0 %v3062_v44, %s3335_s14 }
 0xa84   :  { %1067 = vrot.lane.b32.xlu1 %v3064_v45, %s3335_s14 }
 0xaf5   :  { %v965_v46 = vpop.permute.xlu0 %964 }
 0xaf6   :  { %v1068_v47 = vpop.permute.xlu1 %1067  ;;  %v967_v48 = vmul.f32 %v3058_v28, %v965_v46 }
 0xaf7   :  { %v1070_v50 = vmul.f32 %v3060_v31, %v1068_v47 }
 0xaf8   :  { %969 = vrot.lane.b32.xlu0 %v967_v48, %s3324_s19 }
 0xaf9   :  { %1144 = vrot.lane.b32.xlu1 %v1070_v50, %s3324_s19 }
 0xb6a   :  { %v970_v51 = vpop.permute.xlu0 %969 }
 0xb6b   :  { %v1145_v52 = vpop.permute.xlu1 %1144  ;;  %973 = vst.msk [vmem:[#allocation13 + $0x4] sm:$0x3] %vm105_vm1, %v970_v51  ;;  %2703 = vmatmul.mubr.msk.f32.vlgmr.msra.gmra.mrb[10].mxu0 %vm132_vm2, %v970_v51 }
 0xb6c   :  { %2714 = vmatmul.mubr.msk.f32.vlgmr.msra.gmra.mrb[10].mxu1 %vm132_vm2, %v1145_v52  ;;  %2922 = vmatpush3.bf16.msra.mxu0 %v3471_v5 }
 0xb6d   :  { %2923 = vmatprep.subr.bf16.mxu0 %v3332_v0  ;;  %2724 = vmatprep.mubr.msk.f32.mxu0 %vm3333_vm0, %v3334_v1 }
 0xb6e   :  { %2928 = vmatpush3.bf16.msra.mxu1 %v3493_v30  ;;  %2735 = vmatprep.mubr.msk.f32.mxu1 %vm3333_vm0, %v3334_v1 }
 0xb6f   :  { %2929 = vmatprep.subr.bf16.mxu1 %v3332_v0 }
 0xb70   :  { %2925 = vmatpush3.bf16.msra.mxu0 %v3475_v8 }
 0xb71   :  { %2932 = vmatprep.subr.bf16.mxu0 %v3332_v0 }
 0xb72   :  { %2931 = vmatpush3.bf16.msra.mxu1 %v3497_v37 }
 0xb73   :  { %2725 = vmatmul.mubr.msk.f32.vlgmr.msra.gmra.mrb[12].mxu0 %vm132_vm2, %v1145_v52  ;;  %2938 = vmatprep.subr.bf16.mxu1 %v3332_v0 }
 0xb74   :  { %2934 = vmatpush3.bf16.msra.mxu0 %v3499_v38  ;;  %2746 = vmatprep.mubr.msk.f32.mxu0 %vm3333_vm0, %v3334_v1 }
 0xb75   :  { %2935 = vmatprep.subr.bf16.mxu0 %v3332_v0 }
 0xb78   :  { %2937 = vmatpush3.bf16.msra.mxu0 %v3503_v39 }
 0xb79   :  { %2944 = vmatprep.subr.bf16.mxu0 %v3332_v0 }
 0xc3e   :  { %v1139_v53 = vpop.f32.mrb[10].mxu0 }
 0xc3f   :  { %v1214_v54 = vpop.f32.mrb[10].mxu1  ;;  %v2704_v55 = vpop.f32.mrb[11].mxu0 }
 0xc40   :  { %v1215_v56 = vadd.f32 %v1214_v54, %v1139_v53  ;;  %v2715_v57 = vpop.f32.mrb[11].mxu1 }
 0xc42   :  { %v1218_v58 = vadd.f32 %v3540_v49, %v1215_v56 }
 0xc44   :  { %3065 = vtanh.f32 %v1218_v58  ;;  %v2443_v3 = vmul.f32 -1.442695, %v1218_v58 }
 0xc46   :  { %v1317_v60 = vpop.f32.mrb[12].mxu0 }
 0xc47   :  { %v1321_v61 = vadd.f32 %v1317_v60, %v1250_v59  ;;  %v2726_v62 = vpop.f32.mrb[13].mxu0 }
 0xc49   :  { %3067 = vtanh.f32 %v1321_v61  ;;  %v2445_v4 = vmul.f32 -1.442695, %v1321_v61 }
 0xc4a   :  { %3069 = vpow2.f32 %v2443_v3 }
 0xc4b   :  { %3071 = vpow2.f32 %v2445_v4 }
 0xc4e   :  { %v3066_v63 = vpop.eup %3065 }
 0xc4f   :  { %1228 = vrot.lane.b32.xlu0 %v3066_v63, %s3335_s14 }
 0xc53   :  { %v3068_v2 = vpop.eup %3067 }
 0xc54   :  { %1331 = vrot.lane.b32.xlu1 %v3068_v2, %s3335_s14  ;;  %v3070_v6 = vpop.eup %3069 }
 0xc55   :  { %v1222_v7 = vadd.f32 1.0, %v3070_v6  ;;  %v3072_v9 = vpop.eup %3071 }
 0xc56   :  { %v1325_v10 = vadd.f32 1.0, %v3072_v9 }
 0xc57   :  { %3073 = vrcp.f32 %v1222_v7 }
 0xc58   :  { %3075 = vrcp.f32 %v1325_v10 }
 0xc61   :  { %v3074_v11 = vpop.eup %3073 }
 0xc62   :  { %v3076_v14 = vpop.eup %3075  ;;  %v1226_v17 = vmul.f32 %v3074_v11, %v3627_v42 }
 0xc63   :  { %v1329_v20 = vmul.f32 %v3076_v14, %v3629_v43 }
 0xcc1   :  { %v1229_v12 = vpop.permute.xlu0 %1228 }
 0xcc2   :  { %v1231_v13 = vmul.f32 %v3074_v11, %v1229_v12 }
 0xcc4   :  { %1233 = vrot.lane.b32.xlu0 %v1231_v13, %s3324_s19 }
 0xcc6   :  { %v1332_v15 = vpop.permute.xlu1 %1331 }
 0xcc7   :  { %v1334_v16 = vmul.f32 %v3076_v14, %v1332_v15 }
 0xcc9   :  { %1336 = vrot.lane.b32.xlu1 %v1334_v16, %s3324_s19 }
 0xd36   :  { %v1234_v18 = vpop.permute.xlu0 %1233 }
 0xd37   :  { %v3665_v19 = vadd.f32 %v1234_v18, %v1226_v17 }
 0xd39   :  { %3077 = vtanh.f32 %v3665_v19 }
 0xd3b   :  { %v1337_v21 = vpop.permute.xlu1 %1336 }
 0xd3c   :  { %v3669_v22 = vadd.f32 %v1337_v21, %v1329_v20  ;;  %v1800_v20 = vld [vmem:[#allocation4 + $0xc] sm:$0x3] }
 0xd3e   :  { %3079 = vtanh.f32 %v3669_v22 }
 0xd43   :  { %v3078_v23 = vpop.eup %3077 }
 0xd44   :  { %1239 = vrot.lane.b32.xlu0 %v3078_v23, %s3335_s14 }
 0xd48   :  { %v3080_v24 = vpop.eup %3079 }
 0xd49   :  { %1342 = vrot.lane.b32.xlu1 %v3080_v24, %s3335_s14 }
 0xdb6   :  { %v1240_v25 = vpop.permute.xlu0 %1239 }
 0xdb7   :  { %v1242_v26 = vmul.f32 %v3074_v11, %v1240_v25 }
 0xdb9   :  { %1244 = vrot.lane.b32.xlu0 %v1242_v26, %s3324_s19 }
 0xdbb   :  { %v1343_v27 = vpop.permute.xlu1 %1342 }
 0xdbc   :  { %v1345_v28 = vmul.f32 %v3076_v14, %v1343_v27 }
 0xdbe   :  { %1419 = vrot.lane.b32.xlu1 %v1345_v28, %s3324_s19 }
 0xe2b   :  { %v1245_v29 = vpop.permute.xlu0 %1244 }
 0xe2c   :  { %1248 = vst.msk [vmem:[#allocation13 + $0x6] sm:$0x3] %vm105_vm1, %v1245_v29  ;;  %2736 = vmatmul.mubr.msk.f32.vlgmr.msra.gmra.mrb[12].mxu1 %vm132_vm2, %v1245_v29 }
 0xe2d   :  { %2940 = vmatpush3.bf16.msra.mxu1 %v3471_v5  ;;  %2757 = vmatprep.mubr.msk.f32.mxu1 %vm3333_vm0, %v3334_v1 }
 0xe2e   :  { %2941 = vmatprep.subr.bf16.mxu1 %v3332_v0 }
 0xe30   :  { %v1420_v31 = vpop.permute.xlu1 %1419 }
 0xe31   :  { %2943 = vmatpush3.bf16.msra.mxu1 %v3475_v8  ;;  %2747 = vmatmul.mubr.msk.f32.vlgmr.msra.gmra.mrb[14].mxu0 %vm132_vm2, %v1420_v31 }
 0xe32   :  { %2946 = vmatpush3.bf16.msra.mxu0 %v3493_v30  ;;  %2950 = vmatprep.subr.bf16.mxu1 %v3332_v0 }
 0xe33   :  { %2947 = vmatprep.subr.bf16.mxu0 %v3332_v0  ;;  %2768 = vmatprep.mubr.msk.f32.mxu0 %vm3333_vm0, %v3334_v1 }
 0xe34   :  { %2758 = vmatmul.mubr.msk.f32.vlgmr.msra.gmra.mrb[14].mxu1 %vm132_vm2, %v1420_v31 }
 0xe35   :  { %2952 = vmatpush3.bf16.msra.mxu1 %v3499_v38  ;;  %2779 = vmatprep.mubr.msk.f32.mxu1 %vm3333_vm0, %v3334_v1 }
 0xe36   :  { %2949 = vmatpush3.bf16.msra.mxu0 %v3497_v37  ;;  %2953 = vmatprep.subr.bf16.mxu1 %v3332_v0 }
 0xe37   :  { %2956 = vmatprep.subr.bf16.mxu0 %v3332_v0 }
 0xe39   :  { %2955 = vmatpush3.bf16.msra.mxu1 %v3503_v39 }
 0xe3a   :  { %2962 = vmatprep.subr.bf16.mxu1 %v3332_v0 }
 0xeff   :  { %v1414_v32 = vpop.f32.mrb[12].mxu1 }
 0xf00   :  { %v2737_v33 = vpop.f32.mrb[13].mxu1 }
 0xf04   :  { %v1489_v34 = vpop.f32.mrb[14].mxu0 }
 0xf05   :  { %v1490_v35 = vadd.f32 %v1489_v34, %v1414_v32  ;;  %v2748_v36 = vpop.f32.mrb[15].mxu0 }
 0xf07   :  { %v1493_v41 = vadd.f32 %v3540_v49, %v1490_v35  ;;  %v1592_v42 = vpop.f32.mrb[14].mxu1 }
 0xf08   :  { %v1596_v43 = vadd.f32 %v1592_v42, %v1525_v40  ;;  %v2759_v44 = vpop.f32.mrb[15].mxu1 }
 0xf09   :  { %3081 = vtanh.f32 %v1493_v41  ;;  %v2448_v47 = vmul.f32 -1.442695, %v1493_v41 }
 0xf0a   :  { %3083 = vtanh.f32 %v1596_v43  ;;  %v2450_v48 = vmul.f32 -1.442695, %v1596_v43 }
 0xf0b   :  { %3085 = vpow2.f32 %v2448_v47 }
 0xf0c   :  { %3087 = vpow2.f32 %v2450_v48 }
 0xf13   :  { %v3082_v45 = vpop.eup %3081 }
 0xf14   :  { %v3084_v46 = vpop.eup %3083  ;;  %1503 = vrot.lane.b32.xlu0 %v3082_v45, %s3335_s14 }
 0xf15   :  { %1606 = vrot.lane.b32.xlu1 %v3084_v46, %s3335_s14  ;;  %v3086_v50 = vpop.eup %3085 }
 0xf16   :  { %v3088_v51 = vpop.eup %3087  ;;  %v1497_v52 = vadd.f32 1.0, %v3086_v50 }
 0xf17   :  { %v1600_v53 = vadd.f32 1.0, %v3088_v51 }
 0xf18   :  { %3089 = vrcp.f32 %v1497_v52 }
 0xf19   :  { %3091 = vrcp.f32 %v1600_v53 }
 0xf22   :  { %v3090_v54 = vpop.eup %3089 }
 0xf23   :  { %v3092_v56 = vpop.eup %3091  ;;  %v1501_v60 = vmul.f32 %v3090_v54, %v3665_v19 }
 0xf24   :  { %v1604_v61 = vmul.f32 %v3092_v56, %v3669_v22 }
 0xf86   :  { %v1504_v55 = vpop.permute.xlu0 %1503 }
 0xf87   :  { %v1607_v57 = vpop.permute.xlu1 %1606  ;;  %v1506_v58 = vmul.f32 %v3090_v54, %v1504_v55 }
 0xf88   :  { %v1609_v59 = vmul.f32 %v3092_v56, %v1607_v57 }
 0xf89   :  { %1508 = vrot.lane.b32.xlu0 %v1506_v58, %s3324_s19 }
 0xf8a   :  { %1611 = vrot.lane.b32.xlu1 %v1609_v59, %s3324_s19  ;;  %v2075_v59 = vld [vmem:[#allocation4 + $0xe] sm:$0x3] }
 0xffb   :  { %v1509_v62 = vpop.permute.xlu0 %1508 }
 0xffc   :  { %v1612_v63 = vpop.permute.xlu1 %1611  ;;  %v3705_v2 = vadd.f32 %v1509_v62, %v1501_v60 }
 0xffd   :  { %v3707_v3 = vadd.f32 %v1612_v63, %v1604_v61 }
 0xffe   :  { %3093 = vtanh.f32 %v3705_v2 }
 0xfff   :  { %3095 = vtanh.f32 %v3707_v3 }
0x1008   :  { %v3094_v4 = vpop.eup %3093 }
0x1009   :  { %v3096_v6 = vpop.eup %3095  ;;  %1514 = vrot.lane.b32.xlu0 %v3094_v4, %s3335_s14 }
0x100a   :  { %1617 = vrot.lane.b32.xlu1 %v3096_v6, %s3335_s14 }
0x107b   :  { %v1515_v7 = vpop.permute.xlu0 %1514 }
0x107c   :  { %v1618_v9 = vpop.permute.xlu1 %1617  ;;  %v1517_v10 = vmul.f32 %v3090_v54, %v1515_v7 }
0x107d   :  { %v1620_v11 = vmul.f32 %v3092_v56, %v1618_v9 }
0x107e   :  { %1519 = vrot.lane.b32.xlu0 %v1517_v10, %s3324_s19 }
0x107f   :  { %1694 = vrot.lane.b32.xlu1 %v1620_v11, %s3324_s19 }
0x10f0   :  { %v1520_v12 = vpop.permute.xlu0 %1519 }
0x10f1   :  { %v1695_v13 = vpop.permute.xlu1 %1694  ;;  %1523 = vst.msk [vmem:[#allocation13 + $0x8] sm:$0x3] %vm105_vm1, %v1520_v12  ;;  %2769 = vmatmul.mubr.msk.f32.vlgmr.msra.gmra.mrb[16].mxu0 %vm132_vm2, %v1520_v12 }
0x10f2   :  { %2780 = vmatmul.mubr.msk.f32.vlgmr.msra.gmra.mrb[16].mxu1 %vm132_vm2, %v1695_v13  ;;  %2958 = vmatpush3.bf16.msra.mxu0 %v3471_v5 }
0x10f3   :  { %2959 = vmatprep.subr.bf16.mxu0 %v3332_v0  ;;  %2790 = vmatprep.mubr.msk.f32.mxu0 %vm3333_vm0, %v3334_v1 }
0x10f4   :  { %2964 = vmatpush3.bf16.msra.mxu1 %v3493_v30  ;;  %2801 = vmatprep.mubr.msk.f32.mxu1 %vm3333_vm0, %v3334_v1 }
0x10f5   :  { %2965 = vmatprep.subr.bf16.mxu1 %v3332_v0 }
0x10f6   :  { %2961 = vmatpush3.bf16.msra.mxu0 %v3475_v8 }
0x10f7   :  { %2968 = vmatprep.subr.bf16.mxu0 %v3332_v0 }
0x10f8   :  { %2967 = vmatpush3.bf16.msra.mxu1 %v3497_v37 }
0x10f9   :  { %2791 = vmatmul.mubr.msk.f32.vlgmr.msra.gmra.mrb[18].mxu0 %vm132_vm2, %v1695_v13  ;;  %2974 = vmatprep.subr.bf16.mxu1 %v3332_v0 }
0x10fa   :  { %2970 = vmatpush3.bf16.msra.mxu0 %v3499_v38  ;;  %2812 = vmatprep.mubr.msk.f32.mxu0 %vm3333_vm0, %v3334_v1 }
0x10fb   :  { %2971 = vmatprep.subr.bf16.mxu0 %v3332_v0 }
0x10fe   :  { %2973 = vmatpush3.bf16.msra.mxu0 %v3503_v39 }
0x10ff   :  { %2980 = vmatprep.subr.bf16.mxu0 %v3332_v0 }
0x11c4   :  { %v1689_v14 = vpop.f32.mrb[16].mxu0 }
0x11c5   :  { %v1764_v15 = vpop.f32.mrb[16].mxu1  ;;  %v2770_v16 = vpop.f32.mrb[17].mxu0 }
0x11c6   :  { %v1765_v17 = vadd.f32 %v1764_v15, %v1689_v14  ;;  %v2781_v18 = vpop.f32.mrb[17].mxu1 }
0x11c8   :  { %v1768_v19 = vadd.f32 %v3540_v49, %v1765_v17 }
0x11ca   :  { %3097 = vtanh.f32 %v1768_v19  ;;  %v2453_v26 = vmul.f32 -1.442695, %v1768_v19 }
0x11cc   :  { %v1867_v21 = vpop.f32.mrb[18].mxu0 }
0x11cd   :  { %v1871_v22 = vadd.f32 %v1867_v21, %v1800_v20  ;;  %v2792_v23 = vpop.f32.mrb[19].mxu0 }
0x11cf   :  { %3099 = vtanh.f32 %v1871_v22  ;;  %v2455_v27 = vmul.f32 -1.442695, %v1871_v22 }
0x11d0   :  { %3101 = vpow2.f32 %v2453_v26 }
0x11d1   :  { %3103 = vpow2.f32 %v2455_v27 }
0x11d4   :  { %v3098_v24 = vpop.eup %3097 }
0x11d5   :  { %1778 = vrot.lane.b32.xlu0 %v3098_v24, %s3335_s14 }
0x11d9   :  { %v3100_v25 = vpop.eup %3099 }
0x11da   :  { %1881 = vrot.lane.b32.xlu1 %v3100_v25, %s3335_s14  ;;  %v3102_v28 = vpop.eup %3101 }
0x11db   :  { %v1772_v29 = vadd.f32 1.0, %v3102_v28  ;;  %v3104_v31 = vpop.eup %3103 }
0x11dc   :  { %v1875_v32 = vadd.f32 1.0, %v3104_v31 }
0x11dd   :  { %3105 = vrcp.f32 %v1772_v29 }
0x11de   :  { %3107 = vrcp.f32 %v1875_v32 }
0x11e7   :  { %v3106_v33 = vpop.eup %3105 }
0x11e8   :  { %v3108_v36 = vpop.eup %3107  ;;  %v1776_v42 = vmul.f32 %v3106_v33, %v3705_v2 }
0x11e9   :  { %v1879_v45 = vmul.f32 %v3108_v36, %v3707_v3 }
0x1247   :  { %v1779_v34 = vpop.permute.xlu0 %1778 }
0x1248   :  { %v1781_v35 = vmul.f32 %v3106_v33, %v1779_v34 }
0x124a   :  { %1783 = vrot.lane.b32.xlu0 %v1781_v35, %s3324_s19 }
0x124c   :  { %v1882_v40 = vpop.permute.xlu1 %1881 }
0x124d   :  { %v1884_v41 = vmul.f32 %v3108_v36, %v1882_v40 }
0x124f   :  { %1886 = vrot.lane.b32.xlu1 %v1884_v41, %s3324_s19 }
0x12bc   :  { %v1784_v43 = vpop.permute.xlu0 %1783 }
0x12bd   :  { %v3743_v44 = vadd.f32 %v1784_v43, %v1776_v42 }
0x12bf   :  { %3109 = vtanh.f32 %v3743_v44 }
0x12c1   :  { %v1887_v46 = vpop.permute.xlu1 %1886 }
0x12c2   :  { %v3747_v47 = vadd.f32 %v1887_v46, %v1879_v45 }
0x12c4   :  { %3111 = vtanh.f32 %v3747_v47 }
0x12c9   :  { %v3110_v48 = vpop.eup %3109 }
0x12ca   :  { %1789 = vrot.lane.b32.xlu0 %v3110_v48, %s3335_s14 }
0x12ce   :  { %v3112_v50 = vpop.eup %3111 }
0x12cf   :  { %1892 = vrot.lane.b32.xlu1 %v3112_v50, %s3335_s14 }
0x133c   :  { %v1790_v51 = vpop.permute.xlu0 %1789 }
0x133d   :  { %v1792_v52 = vmul.f32 %v3106_v33, %v1790_v51 }
0x133f   :  { %1794 = vrot.lane.b32.xlu0 %v1792_v52, %s3324_s19 }
0x1341   :  { %v1893_v53 = vpop.permute.xlu1 %1892 }
0x1342   :  { %v1895_v54 = vmul.f32 %v3108_v36, %v1893_v53 }
0x1344   :  { %1969 = vrot.lane.b32.xlu1 %v1895_v54, %s3324_s19 }
0x13b1   :  { %v1795_v55 = vpop.permute.xlu0 %1794 }
0x13b2   :  { %1798 = vst.msk [vmem:[#allocation13 + $0xa] sm:$0x3] %vm105_vm1, %v1795_v55  ;;  %2802 = vmatmul.mubr.msk.f32.vlgmr.msra.gmra.mrb[18].mxu1 %vm132_vm2, %v1795_v55 }
0x13b3   :  { %2976 = vmatpush3.bf16.msra.mxu1 %v3471_v5  ;;  %2823 = vmatprep.mubr.msk.f32.mxu1 %vm3333_vm0, %v3334_v1 }
0x13b4   :  { %2977 = vmatprep.subr.bf16.mxu1 %v3332_v0 }
0x13b6   :  { %v1970_v56 = vpop.permute.xlu1 %1969 }
0x13b7   :  { %2979 = vmatpush3.bf16.msra.mxu1 %v3475_v8  ;;  %2813 = vmatmul.mubr.msk.f32.vlgmr.msra.gmra.mrb[20].mxu0 %vm132_vm2, %v1970_v56 }
0x13b8   :  { %2986 = vmatprep.subr.bf16.mxu1 %v3332_v0  ;;  %2982 = vmatpush3.bf16.msra.mxu0 %v3493_v30 }
0x13b9   :  { %2983 = vmatprep.subr.bf16.mxu0 %v3332_v0  ;;  %2834 = vmatprep.mubr.msk.f32.mxu0 %vm3333_vm0, %v3334_v1 }
0x13ba   :  { %2824 = vmatmul.mubr.msk.f32.vlgmr.msra.gmra.mrb[20].mxu1 %vm132_vm2, %v1970_v56 }
0x13bb   :  { %2988 = vmatpush3.bf16.msra.mxu1 %v3499_v38  ;;  %2845 = vmatprep.mubr.msk.f32.mxu1 %vm3333_vm0, %v3334_v1 }
0x13bc   :  { %2989 = vmatprep.subr.bf16.mxu1 %v3332_v0  ;;  %2985 = vmatpush3.bf16.msra.mxu0 %v3497_v37 }
0x13bf   :  { %2991 = vmatpush3.bf16.msra.mxu1 %v3503_v39 }
0x1485   :  { %v1964_v5 = vpop.f32.mrb[18].mxu1 }
0x1486   :  { %v2803_v8 = vpop.f32.mrb[19].mxu1 }
0x148a   :  { %v2039_v30 = vpop.f32.mrb[20].mxu0 }
0x148b   :  { %v2040_v57 = vadd.f32 %v2039_v30, %v1964_v5  ;;  %v2814_v58 = vpop.f32.mrb[21].mxu0 }
0x148d   :  { %v2043_v60 = vadd.f32 %v3540_v49, %v2040_v57  ;;  %v2142_v61 = vpop.f32.mrb[20].mxu1 }
0x148e   :  { %v2146_v62 = vadd.f32 %v2142_v61, %v2075_v59  ;;  %v2825_v38 = vpop.f32.mrb[21].mxu1 }
0x148f   :  { %3113 = vtanh.f32 %v2043_v60  ;;  %v2458_v0 = vmul.f32 -1.442695, %v2043_v60 }
0x1490   :  { %3115 = vtanh.f32 %v2146_v62  ;;  %v2460_v37 = vmul.f32 -1.442695, %v2146_v62 }
0x1491   :  { %3117 = vpow2.f32 %v2458_v0 }
0x1492   :  { %3119 = vpow2.f32 %v2460_v37 }
0x1499   :  { %v3114_v1 = vpop.eup %3113 }
0x149a   :  { %v3116_v63 = vpop.eup %3115  ;;  %2053 = vrot.lane.b32.xlu0 %v3114_v1, %s3335_s14 }
0x149b   :  { %2156 = vrot.lane.b32.xlu1 %v3116_v63, %s3335_s14  ;;  %v3118_v39 = vpop.eup %3117 }
0x149c   :  { %v3120_v2 = vpop.eup %3119  ;;  %v2047_v3 = vadd.f32 1.0, %v3118_v39 }
0x149d   :  { %v2150_v4 = vadd.f32 1.0, %v3120_v2 }
0x149e   :  { %3121 = vrcp.f32 %v2047_v3 }
0x149f   :  { %3123 = vrcp.f32 %v2150_v4 }
0x14a8   :  { %v3122_v6 = vpop.eup %3121 }
0x14a9   :  { %v3124_v9 = vpop.eup %3123  ;;  %v2051_v13 = vmul.f32 %v3122_v6, %v3743_v44 }
0x14aa   :  { %v2154_v14 = vmul.f32 %v3124_v9, %v3747_v47 }
0x150c   :  { %v2054_v7 = vpop.permute.xlu0 %2053 }
0x150d   :  { %v2157_v10 = vpop.permute.xlu1 %2156  ;;  %v2056_v11 = vmul.f32 %v3122_v6, %v2054_v7 }
0x150e   :  { %v2159_v12 = vmul.f32 %v3124_v9, %v2157_v10 }
0x150f   :  { %2058 = vrot.lane.b32.xlu0 %v2056_v11, %s3324_s19 }
0x1510   :  { %2161 = vrot.lane.b32.xlu1 %v2159_v12, %s3324_s19 }
0x1581   :  { %v2059_v15 = vpop.permute.xlu0 %2058 }
0x1582   :  { %v2162_v16 = vpop.permute.xlu1 %2161  ;;  %v2061_v17 = vadd.f32 %v2059_v15, %v2051_v13 }
0x1583   :  { %v2164_v18 = vadd.f32 %v2162_v16, %v2154_v14 }
0x1584   :  { %3125 = vtanh.f32 %v2061_v17 }
0x1585   :  { %3127 = vtanh.f32 %v2164_v18 }
0x158e   :  { %v3126_v19 = vpop.eup %3125 }
0x158f   :  { %v3128_v20 = vpop.eup %3127  ;;  %2064 = vrot.lane.b32.xlu0 %v3126_v19, %s3335_s14 }
0x1590   :  { %2167 = vrot.lane.b32.xlu1 %v3128_v20, %s3335_s14 }
0x1601   :  { %v2065_v21 = vpop.permute.xlu0 %2064 }
0x1602   :  { %v2168_v22 = vpop.permute.xlu1 %2167  ;;  %v2067_v23 = vmul.f32 %v3122_v6, %v2065_v21 }
0x1603   :  { %v2170_v24 = vmul.f32 %v3124_v9, %v2168_v22 }
0x1604   :  { %2069 = vrot.lane.b32.xlu0 %v2067_v23, %s3324_s19 }
0x1605   :  { %2244 = vrot.lane.b32.xlu1 %v2170_v24, %s3324_s19 }
0x1676   :  { %v2070_v25 = vpop.permute.xlu0 %2069 }
0x1677   :  { %v2245_v26 = vpop.permute.xlu1 %2244  ;;  %2073 = vst.msk [vmem:[#allocation13 + $0xc] sm:$0x3] %vm105_vm1, %v2070_v25  ;;  %2835 = vmatmul.mubr.msk.f32.vlgmr.msra.gmra.mrb[22].mxu0 %vm132_vm2, %v2070_v25 }
0x1678   :  { %2350 = vst.msk [vmem:[#allocation2] sm:$0x3] %vm105_vm1, %v2245_v26  ;;  %2846 = vmatmul.mubr.msk.f32.vlgmr.msra.gmra.mrb[22].mxu1 %vm132_vm2, %v2245_v26 }
0x167f   :  { %v2365_v27 = vld [vmem:[#allocation2] sm:$0x3] }
0x1680   :  { %2367 = vst.msk [vmem:[#allocation14] sm:$0x3] %vm105_vm1, %v2365_v27 }
0x174a   :  { %v2239_v28 = vpop.f32.mrb[22].mxu0 }
0x174b   :  { %v2314_v29 = vpop.f32.mrb[22].mxu1  ;;  %v2836_v31 = vpop.f32.mrb[23].mxu0 }
0x174c   :  { %v2315_v32 = vadd.f32 %v2314_v29, %v2239_v28  ;;  %v2847_v33 = vpop.f32.mrb[23].mxu1 }
0x174e   :  { %v2318_v34 = vadd.f32 %v3540_v49, %v2315_v32 }
0x1750   :  { %3129 = vtanh.f32 %v2318_v34  ;;  %v2463_v36 = vmul.f32 -1.442695, %v2318_v34 }
0x1752   :  { %3131 = vpow2.f32 %v2463_v36 }
0x175a   :  { %v3130_v35 = vpop.eup %3129 }
0x175b   :  { %2328 = vrot.lane.b32.xlu0 %v3130_v35, %s3335_s14 }
0x175c   :  { %v3132_v40 = vpop.eup %3131 }
0x175d   :  { %v2322_v41 = vadd.f32 1.0, %v3132_v40 }
0x175f   :  { %3133 = vrcp.f32 %v2322_v41 }
0x1769   :  { %v3134_v42 = vpop.eup %3133 }
0x176a   :  { %v2326_v45 = vmul.f32 %v3134_v42, %v2061_v17 }
0x17cd   :  { %v2329_v43 = vpop.permute.xlu0 %2328 }
0x17ce   :  { %v2331_v44 = vmul.f32 %v3134_v42, %v2329_v43 }
0x17d0   :  { %2333 = vrot.lane.b32.xlu1 %v2331_v44, %s3324_s19 }
0x1842   :  { %v2334_v46 = vpop.permute.xlu1 %2333 }
0x1843   :  { %v2336_v47 = vadd.f32 %v2334_v46, %v2326_v45 }
0x1845   :  { %3135 = vtanh.f32 %v2336_v47 }
0x184f   :  { %v3136_v48 = vpop.eup %3135 }
0x1850   :  { %2339 = vrot.lane.b32.xlu0 %v3136_v48, %s3335_s14 }
0x1854   :  { %2352 = vrot.lane.b32.xlu0 %v2164_v18, %s3336_s2 }
0x18c2   :  { %v2340_v49 = vpop.permute.xlu0 %2339 }
0x18c3   :  { %v2342_v50 = vmul.f32 %v3134_v42, %v2340_v49 }
0x18c5   :  { %2344 = vrot.lane.b32.xlu1 %v2342_v50, %s3324_s19 }
0x18c6   :  { %v2353_v51 = vpop.permute.xlu0 %2352 }
0x18c7   :  { %2355 = vst.msk [vmem:[#allocation3] sm:$0x3] %vm105_vm1, %v2353_v51 }
0x18c9   :  { %2358 = vrot.lane.b32.xlu1 %v2336_v47, %s3336_s2 }
0x18ce   :  { %v2369_v52 = vld [vmem:[#allocation3] sm:$0x3] }
0x18cf   :  { %2371 = vst.msk [vmem:[#allocation16] sm:$0x3] %vm105_vm1, %v2369_v52 }
0x1937   :  { %v2345_v53 = vpop.permute.xlu1 %2344 }
0x1938   :  { %2348 = vst.msk [vmem:[#allocation13 + $0xe] sm:$0x3] %vm105_vm1, %v2345_v53  ;;  %2356 = vst.msk [vmem:[#allocation2 + $0x2] sm:$0x3] %vm105_vm1, %v2345_v53 }
0x1939   :  { %3258 = shalt.err (!%p3255_p2)
}
0x193a   :  { %s3259_s0 = scalar_lea.hbm %s3854_s7, 256 }
0x193b   :  { %p3260_p3 = scmp.ne.s32.totalorder %s3854_s7, %s3259_s0  ;;  %p3263_p4 = scmp.lt.u32.totalorder %s3259_s0, %s3854_s7 }
0x193d   :  { %p3265_p5 = pnand %p3263_p4, %p3260_p3 }
0x193f   :  { %3268 = shalt.err (!%p3265_p5)
}
0x1940   :  { %2384 = dma.vmem_to_hbm [thread:$0]  %s2379_s16, 256, %s3854_s7, [#allocation6], %s3324_s19, %s3324_s19, %s3325_s20   ;;  %v2359_v54 = vpop.permute.xlu1 %2358  ;;  %v2366_v55 = vld [vmem:[#allocation2 + $0x2] sm:$0x3] }
0x1941   :  { %s3338_s4 = smov [#allocation14]   ;;  %2361 = vst.msk [vmem:[#allocation3 + $0x2] sm:$0x3] %vm105_vm1, %v2359_v54  ;;  %s3339_s29 = smov [#allocation16]   ;;  %2368 = vst.msk [vmem:[#allocation14 + $0x2] sm:$0x3] %vm105_vm1, %v2366_v55 }
0x1942   :  { %s2390_s24 = sshll.u32 %s3338_s4, 4  ;;  %s2402_s11 = sshll.u32 %s3339_s29, 4  ;;  %s2391_s24 = int_to_ptr.vmem [resolvable:$true] %s2390_s24  ;;  %s2403_s11 = int_to_ptr.vmem [resolvable:$true] %s2402_s11 }
0x1943   :  { %s3269_s3 = scalar_lea.vmem %s2391_s24, 64  ;;  %p3274_p7 = scmp.lt.s32.totalorder %s2391_s24, %s2391_s24 }
0x1944   :  { %p3270_p6 = scmp.ne.s32.totalorder %s2391_s24, %s3269_s3  ;;  %p3275_p8 = scmp.lt.s32.totalorder %s3269_s3, %s3269_s3 }
0x1946   :  { %p3276_p9 = por %p3275_p8, %p3274_p7 }
0x1948   :  { %p3277_p10 = pnand %p3276_p9, %p3270_p6 }
0x194a   :  { %3280 = shalt.err (!%p3277_p10)
}
0x194b   :  { %s3281_s5 = scalar_lea.hbm %s3855_s8, 64 }
0x194c   :  { %p3282_p11 = scmp.ne.s32.totalorder %s3855_s8, %s3281_s5  ;;  %p3285_p12 = scmp.lt.u32.totalorder %s3281_s5, %s3855_s8 }
0x194e   :  { %p3287_p13 = pnand %p3285_p12, %p3282_p11 }
0x1950   :  { %3290 = shalt.err (!%p3287_p13)
}
0x1951   :  { %2396 = dma.vmem_to_hbm [thread:$0]  %s2391_s24, 64, %s3855_s8, [#allocation15], %s3324_s19, %s3324_s19, %s3325_s20   ;;  %v2370_v56 = vld [vmem:[#allocation3 + $0x2] sm:$0x3] }
0x1952   :  { %2372 = vst.msk [vmem:[#allocation16 + $0x2] sm:$0x3] %vm105_vm1, %v2370_v56  ;;  %s3291_s2 = scalar_lea.vmem %s2403_s11, 64  ;;  %p3296_p1 = scmp.lt.s32.totalorder %s2403_s11, %s2403_s11 }
0x1953   :  { %p3292_p0 = scmp.ne.s32.totalorder %s2403_s11, %s3291_s2  ;;  %p3297_p2 = scmp.lt.s32.totalorder %s3291_s2, %s3291_s2 }
0x1955   :  { %p3298_p3 = por %p3297_p2, %p3296_p1 }
0x1957   :  { %p3299_p4 = pnand %p3298_p3, %p3292_p0 }
0x1959   :  { %3302 = shalt.err (!%p3299_p4)
}
0x195a   :  { %s3303_s17 = scalar_lea.hbm %s3856_s9, 64 }
0x195b   :  { %p3304_p5 = scmp.ne.s32.totalorder %s3856_s9, %s3303_s17  ;;  %p3307_p6 = scmp.lt.u32.totalorder %s3303_s17, %s3856_s9 }
0x195d   :  { %p3309_p7 = pnand %p3307_p6, %p3304_p5 }
0x195f   :  { %3312 = shalt.err (!%p3309_p7)
}
0x1960   :  { %2408 = dma.vmem_to_hbm [thread:$0]  %s2403_s11, 64, %s3856_s9, [#allocation15], %s3324_s19, %s3324_s19, %s3325_s20  }
0x1961   :  { %3319 = dma.done.wait [#allocation6], 256  }
0x1962   :  { %3320 = vsyncadd [#allocation6], 4294967040 }
0x1963   :  { %3321 = dma.done.wait [#allocation15], 128  }
0x1964   :  { %3322 = vsyncadd [#allocation15], 4294967168 }
0x1965   :  { %2418 = vsyncpa [#allocation5], 1 }
0x1966   :  { %2419 = vsyncpa [#allocation8], 1 }
0x1967   :  { %2420 = vsyncpa [#allocation11], 1 }
0x1968   :  { %2421 = vsyncpa [#allocation6], 1 }
0x1969   :  { %2422 = vsyncpa [#allocation15], 1 }

</bundles_post_ra>
